<compile_context>
chip_gen: v7x
topology: tpu7x:2x2x1
jax: 0.10.0
libtpu: 0.0.40
codegen_flags: <defaults>
</compile_context>

<pallas_src>
import functools

import numpy as np
import jax
import jax.numpy as jnp
from jax.experimental import pallas as pl
from jax.experimental.pallas import tpu as pltpu


# --------------------------------------------------------------------------
# Host-side constants
# --------------------------------------------------------------------------
def _upsample_matrix(n):
    """1-D PyTorch bilinear (align_corners=False) 2x interpolation matrix (2n, n)."""
    m = 2 * n
    dst = np.arange(m, dtype=np.float64)
    src = np.clip((dst + 0.5) / 2.0 - 0.5, 0.0, n - 1)
    lo = np.floor(src).astype(np.int64)
    hi = np.minimum(lo + 1, n - 1)
    frac = src - lo
    u = np.zeros((m, n), dtype=np.float32)
    u[np.arange(m), lo] += (1.0 - frac).astype(np.float32)
    u[np.arange(m), hi] += frac.astype(np.float32)
    return u


# --------------------------------------------------------------------------
# Fused kernel: conv chain + residual + ReLU + bilinear x2, per image.
# --------------------------------------------------------------------------
def _fused_kernel(H, W, OFF,
                  x_ref, w0_ref, wva_ref, wha_ref, wvb_ref, whb_ref,
                  shifts_ref, masks_ref, ut_ref, o_ref,
                  pad_in, pad_dec):
    HW = H * W
    Cin = x_ref.shape[1]
    CinP = pad_in.shape[0]                 # Cin padded to a multiple of 8

    lmask = masks_ref[0:1, :]              # 0 where w == 0      (for dx = -1 taps)
    rmask = masks_ref[1:2, :]              # 0 where w == W - 1  (for dx = +1 taps)

    # Zero only the pad strips; the interior is fully overwritten every stage.
    # Unconditional per step -> safe under 'parallel' (megacore) grid sharding.
    def zero_strips(pad_ref):
        z = jnp.zeros((pad_ref.shape[0], OFF), jnp.float32)
        pad_ref[:, 0:OFF] = z                            # aligned full-vreg stores
        pad_ref[:, OFF + HW:OFF + HW + OFF] = z

    zero_strips(pad_in)
    zero_strips(pad_dec)
    if CinP > Cin:                                       # zero the channel-pad rows
        pad_in[Cin:CinP, OFF:OFF + HW] = jnp.zeros((CinP - Cin, HW), jnp.float32)

    def patch(pad_ref, dy, dxk):
        # spatial tap offset (dy-1, dxk-1): a static lane-shifted read from the
        # zero-padded flat buffer, plus a horizontal boundary mask.
        start = OFF + (dy - 1) * W + (dxk - 1)
        p = pad_ref[:, start:start + HW]
        if dxk == 0:
            p = p * lmask
        elif dxk == 2:
            p = p * rmask
        return p

    def conv(pad_ref, w_ref, taps, stage, residual=None):
        # Stack the taps on the contraction axis -> ONE MXU matmul per conv stage
        # (K = ntaps * C), instead of ntaps tiny matmuls + a VPU accumulate chain.
        stk = jnp.concatenate([patch(pad_ref, dy, dxk) for dy, dxk in taps], axis=0)
        out = jnp.dot(w_ref[...], stk, preferred_element_type=jnp.float32)
        out = out + shifts_ref[:, stage:stage + 1]       # bias / folded BN shift
        if residual is not None:
            out = out + residual
        return jnp.maximum(out, 0.0)                     # ReLU (f32 VPU)

    taps_3x3 = [(dy, dx) for dy in range(3) for dx in range(3)]
    taps_3x1 = [(dy, 1) for dy in range(3)]
    taps_1x3 = [(1, dx) for dx in range(3)]

    # ---- ConvBNAct: 3x3 conv + folded BN + ReLU ---------------------------
    pad_in[0:Cin, OFF:OFF + HW] = x_ref[0]               # lane-aligned interior store
    ident = conv(pad_in, w0_ref, taps_3x3, 0)            # (Cdec, HW), VMEM resident

    # ---- NonBottleneck1D --------------------------------------------------
    pad_dec[:, OFF:OFF + HW] = ident
    a = conv(pad_dec, wva_ref, taps_3x1, 1)
    pad_dec[:, OFF:OFF + HW] = a
    a = conv(pad_dec, wha_ref, taps_1x3, 2)
    pad_dec[:, OFF:OFF + HW] = a
    a = conv(pad_dec, wvb_ref, taps_3x1, 3)
    pad_dec[:, OFF:OFF + HW] = a
    out = conv(pad_dec, whb_ref, taps_1x3, 4, residual=ident)

    # ---- bilinear x2 upsample (align_corners=False) as one MXU matmul -----
    # ut is stored bf16 (all entries exact in bf16); upcast once in-kernel.
    o_ref[0] = jnp.dot(out, ut_ref[...].astype(jnp.float32),
                       preferred_element_type=jnp.float32)


# --------------------------------------------------------------------------
# Parameters (deterministic synthetic init, matching the PyTorch module shapes)
# --------------------------------------------------------------------------
def _bn_params(key, c):
    k1, k2, k3, k4 = jax.random.split(key, 4)
    return dict(
        gamma=1.0 + 0.1 * jax.random.normal(k1, (c,), jnp.float32),
        beta=0.1 * jax.random.normal(k2, (c,), jnp.float32),
        mean=0.1 * jax.random.normal(k3, (c,), jnp.float32),
        var=1.0 + 0.1 * jax.random.uniform(k4, (c,), jnp.float32),
    )


def fold_bn(bn, eps):
    s = bn["gamma"] / jnp.sqrt(bn["var"] + eps)
    t = bn["beta"] - bn["mean"] * s
    return s, t


def init_params(key, cin, cdec):
    ks = jax.random.split(key, 12)
    w = lambda k, shape: 0.1 * jax.random.normal(k, shape, jnp.float32)
    p = {}
    # ConvBNAct: 3x3 conv, padding=1, no bias, + BN(eps=1e-5) + ReLU
    p["w3x3"] = w(ks[0], (3, 3, cin, cdec))
    p["bn0"] = _bn_params(ks[1], cdec)
    # NonBottleneck1D (standard ESANet block, dilation=1, stride=1, dropout=0)
    p["w31_1"] = w(ks[2], (3, 1, cdec, cdec)); p["b31_1"] = w(ks[3], (cdec,))
    p["w13_1"] = w(ks[4], (1, 3, cdec, cdec)); p["b13_1"] = w(ks[5], (cdec,))
    p["bn1"] = _bn_params(ks[6], cdec)
    p["w31_2"] = w(ks[7], (3, 1, cdec, cdec)); p["b31_2"] = w(ks[8], (cdec,))
    p["w13_2"] = w(ks[9], (1, 3, cdec, cdec)); p["b13_2"] = w(ks[10], (cdec,))
    p["bn2"] = _bn_params(ks[11], cdec)
    # NOTE: side_output (1x1 conv) and conv1x1 exist in __init__ but are unused
    # in the eval-mode forward pass.
    return p


# --------------------------------------------------------------------------
# Forward wrapper (host glue: BN folding into weights, constants, pallas_call)
# --------------------------------------------------------------------------
def decoder_thermal_module_forward(x_nchw, p):
    N, Cin, H, W = x_nchw.shape
    Cdec = p["w3x3"].shape[-1]
    HW = H * W
    OFF = 128 * ((W + 1 + 127) // 128)     # lane-aligned pad strip (>= W+1, mult of 128)
    PADW = HW + 2 * OFF
    CinP = ((Cin + 7) // 8) * 8            # sublane-aligned channel count for the stack

    def stack_w(w, scale=None, ci_pad=None):
        # (kh, kw, ci, co) -> (co, kh*kw*ci_pad): lane-dense, tap-major / channel-minor,
        # matching the in-kernel concat order. Optional BN scale folded per out channel.
        kh, kw, ci, co = w.shape
        wt = jnp.transpose(w, (3, 0, 1, 2))                      # (co, kh, kw, ci)
        if ci_pad is not None and ci_pad != ci:
            wt = jnp.pad(wt, ((0, 0), (0, 0), (0, 0), (0, ci_pad - ci)))
            ci = ci_pad
        wt = wt.reshape(co, kh * kw * ci)
        if scale is not None:
            wt = wt * scale[:, None]
        return wt.astype(jnp.float32)

    s0, t0 = fold_bn(p["bn0"], 1e-5)
    s1, t1 = fold_bn(p["bn1"], 1e-3)
    s2, t2 = fold_bn(p["bn2"], 1e-3)

    w0 = stack_w(p["w3x3"], s0, CinP)                    # (Cdec, 9*CinP)
    wva = stack_w(p["w31_1"])                            # (Cdec, 3*Cdec)
    wha = stack_w(p["w13_1"], s1)
    wvb = stack_w(p["w31_2"])
    whb = stack_w(p["w13_2"], s2)

    shifts = jnp.stack(
        [t0, p["b31_1"], p["b13_1"] * s1 + t1, p["b31_2"], p["b13_2"] * s2 + t2],
        axis=1).astype(jnp.float32)                      # (Cdec, 5)

    # Host constants: horizontal-boundary masks and the exact bilinear-x2 matrix.
    col = np.arange(HW) % W
    masks = jnp.asarray(np.stack([(col != 0), (col != W - 1)]).astype(np.float32))
    u_full = np.kron(_upsample_matrix(H), _upsample_matrix(W))   # (4HW, HW)
    # Entries are in {0, 1/16, 3/16, 1/4, 9/16, 3/4, 1}: exactly representable in bf16,
    # so the bf16 storage + in-kernel upcast is bit-exact while halving the DMA.
    ut = jnp.asarray(u_full.T).astype(jnp.bfloat16)              # (HW, 4HW)

    x_flat = x_nchw.reshape(N, Cin, HW).astype(jnp.float32)

    flops = int(N * (2 * HW * (9 * CinP * Cdec + 12 * Cdec * Cdec)
                     + 2 * Cdec * HW * 4 * HW))
    bytes_accessed = int(4 * (x_flat.size + w0.size + wva.size + wha.size
                              + wvb.size + whb.size + shifts.size + masks.size
                              + N * Cdec * 4 * HW) + 2 * ut.size)

    out_flat = pl.pallas_call(
        functools.partial(_fused_kernel, H, W, OFF),
        out_shape=jax.ShapeDtypeStruct((N, Cdec, 4 * HW), jnp.float32),
        grid=(N,),
        in_specs=[
            pl.BlockSpec((1, Cin, HW), lambda n: (n, 0, 0)),
            # Invariant operands: constant index_map -> fetched once across the grid.
            pl.BlockSpec((Cdec, 9 * CinP), lambda n: (0, 0)),
            pl.BlockSpec((Cdec, 3 * Cdec), lambda n: (0, 0)),
            pl.BlockSpec((Cdec, 3 * Cdec), lambda n: (0, 0)),
            pl.BlockSpec((Cdec, 3 * Cdec), lambda n: (0, 0)),
            pl.BlockSpec((Cdec, 3 * Cdec), lambda n: (0, 0)),
            pl.BlockSpec((Cdec, 5), lambda n: (0, 0)),
            pl.BlockSpec((2, HW), lambda n: (0, 0)),
            pl.BlockSpec((HW, 4 * HW), lambda n: (0, 0)),
        ],
        out_specs=pl.BlockSpec((1, Cdec, 4 * HW), lambda n: (n, 0, 0)),
        scratch_shapes=[
            pltpu.VMEM((CinP, PADW), jnp.float32),   # padded input image
            pltpu.VMEM((Cdec, PADW), jnp.float32),   # padded intermediate activation
        ],
        compiler_params=pltpu.CompilerParams(dimension_semantics=("parallel",)),
        cost_estimate=pl.CostEstimate(flops=flops, transcendentals=0,
                                      bytes_accessed=bytes_accessed),
    )(x_flat, w0, wva, wha, wvb, whb, shifts, masks, ut)

    out = out_flat.reshape(N, Cdec, 2 * H, 2 * W)    # NCHW, like PyTorch
    # TODO(synk): training-mode branch (out_side = side_output(out), batch-stat BN)
    # not implemented; eval mode returns out_side = None as in the reference.
    return out, None


# --------------------------------------------------------------------------
# Pure-JAX reference (lax conv + jax.image.resize) for the correctness check.
# --------------------------------------------------------------------------
def _ref_conv(x, w, kh, kw, scale, shift, residual=None, relu=True):
    pad = ((kh // 2, kh // 2), (kw // 2, kw // 2))
    y = jax.lax.conv_general_dilated(
        x, w, (1, 1), pad, dimension_numbers=("NCHW", "HWIO", "NCHW"))
    y = y * scale[None, :, None, None] + shift[None, :, None, None]
    if residual is not None:
        y = y + residual
    if relu:
        y = jnp.maximum(y, 0.0)
    return y


def ref_forward(x_nchw, p):
    cdec = p["w3x3"].shape[-1]
    ones = jnp.ones((cdec,), jnp.float32)
    s0, t0 = fold_bn(p["bn0"], 1e-5)
    out = _ref_conv(x_nchw, p["w3x3"], 3, 3, s0, t0)
    ident = out
    out = _ref_conv(out, p["w31_1"], 3, 1, ones, p["b31_1"])
    s1, t1 = fold_bn(p["bn1"], 1e-3)
    out = _ref_conv(out, p["w13_1"], 1, 3, s1, p["b13_1"] * s1 + t1)
    out = _ref_conv(out, p["w31_2"], 3, 1, ones, p["b31_2"])
    s2, t2 = fold_bn(p["bn2"], 1e-3)
    out = _ref_conv(out, p["w13_2"], 1, 3, s2, p["b13_2"] * s2 + t2, residual=ident)
    N, C, H, W = out.shape
    out = jax.image.resize(out, (N, C, 2 * H, 2 * W), method="bilinear")
    return out, None


if __name__ == "__main__":
    N, Cin, Cdec, H, W = 2, 4, 8, 16, 16
    key = jax.random.PRNGKey(0)
    k_x, k_p = jax.random.split(key)

    # PyTorch-style NCHW input (2, 4, 16, 16).
    x = jax.random.normal(k_x, (N, Cin, H, W), jnp.float32)
    params = init_params(k_p, Cin, Cdec)

    out, out_side = jax.jit(decoder_thermal_module_forward)(x, params)
    out = jax.block_until_ready(out)

    ref, _ = ref_forward(x, params)
    np.testing.assert_allclose(np.asarray(out), np.asarray(ref), rtol=1e-4, atol=1e-4)
    assert out.shape == (N, Cdec, 2 * H, 2 * W)
    assert out_side is None

    print("KERNEL_OK")
</pallas_src>

<mosaic_0001>
module attributes {stable_mosaic.version = 11 : i64} {
  func.func @_fused_kernel(%arg0: i32, %arg1: memref<1x4x256xf32, #tpu.memory_space<vmem>>, %arg2: memref<8x72xf32, #tpu.memory_space<vmem>>, %arg3: memref<8x24xf32, #tpu.memory_space<vmem>>, %arg4: memref<8x24xf32, #tpu.memory_space<vmem>>, %arg5: memref<8x24xf32, #tpu.memory_space<vmem>>, %arg6: memref<8x24xf32, #tpu.memory_space<vmem>>, %arg7: memref<8x5xf32, #tpu.memory_space<vmem>>, %arg8: memref<2x256xf32, #tpu.memory_space<vmem>>, %arg9: memref<256x1024xbf16, #tpu.memory_space<vmem>>, %arg10: memref<1x8x1024xf32, #tpu.memory_space<vmem>>, %arg11: memref<8x512xf32, #tpu.memory_space<vmem>>, %arg12: memref<8x512xf32, #tpu.memory_space<vmem>>) attributes {dimension_semantics = [#tpu.dimension_semantics<parallel>], iteration_bounds = array<i64: 2>, scalar_prefetch = 0 : i64, scratch_operands = 2 : i64, tpu.core_type = #tpu.core_type<tc>, window_params = [{transform_indices = @transform_0, window_bounds = array<i64: 1, 4, 256>}, {pipeline_mode = #tpu.pipeline_mode<synchronous>, transform_indices = @transform_1, window_bounds = array<i64: 8, 72>}, {pipeline_mode = #tpu.pipeline_mode<synchronous>, transform_indices = @transform_2, window_bounds = array<i64: 8, 24>}, {pipeline_mode = #tpu.pipeline_mode<synchronous>, transform_indices = @transform_3, window_bounds = array<i64: 8, 24>}, {pipeline_mode = #tpu.pipeline_mode<synchronous>, transform_indices = @transform_4, window_bounds = array<i64: 8, 24>}, {pipeline_mode = #tpu.pipeline_mode<synchronous>, transform_indices = @transform_5, window_bounds = array<i64: 8, 24>}, {pipeline_mode = #tpu.pipeline_mode<synchronous>, transform_indices = @transform_6, window_bounds = array<i64: 8, 5>}, {pipeline_mode = #tpu.pipeline_mode<synchronous>, transform_indices = @transform_7, window_bounds = array<i64: 2, 256>}, {pipeline_mode = #tpu.pipeline_mode<synchronous>, transform_indices = @transform_8, window_bounds = array<i64: 256, 1024>}, {transform_indices = @transform_9, window_bounds = array<i64: 1, 8, 1024>}]} {
    %c0 = arith.constant 0 : index
    %c0_0 = arith.constant 0 : index
    %0 = vector.load %arg8[%c0, %c0_0] : memref<2x256xf32, #tpu.memory_space<vmem>>, vector<1x256xf32>
    %c1 = arith.constant 1 : index
    %c0_1 = arith.constant 0 : index
    %1 = vector.load %arg8[%c1, %c0_1] : memref<2x256xf32, #tpu.memory_space<vmem>>, vector<1x256xf32>
    %cst = arith.constant 0.000000e+00 : f32
    %2 = vector.broadcast %cst : f32 to vector<8x128xf32>
    %c0_2 = arith.constant 0 : index
    %c0_3 = arith.constant 0 : index
    %3 = vector.load %arg11[%c0_2, %c0_3] : memref<8x512xf32, #tpu.memory_space<vmem>>, vector<8x128xf32>
    tpu.vector_store %arg11[%c0_2, %c0_3], %2 {strides = array<i32>} : memref<8x512xf32, #tpu.memory_space<vmem>>, vector<8x128xf32>,
    %c0_4 = arith.constant 0 : index
    %c384 = arith.constant 384 : index
    %4 = vector.load %arg11[%c0_4, %c384] : memref<8x512xf32, #tpu.memory_space<vmem>>, vector<8x128xf32>
    tpu.vector_store %arg11[%c0_4, %c384], %2 {strides = array<i32>} : memref<8x512xf32, #tpu.memory_space<vmem>>, vector<8x128xf32>,
    %cst_5 = arith.constant 0.000000e+00 : f32
    %5 = vector.broadcast %cst_5 : f32 to vector<8x128xf32>
    %c0_6 = arith.constant 0 : index
    %c0_7 = arith.constant 0 : index
    %6 = vector.load %arg12[%c0_6, %c0_7] : memref<8x512xf32, #tpu.memory_space<vmem>>, vector<8x128xf32>
    tpu.vector_store %arg12[%c0_6, %c0_7], %5 {strides = array<i32>} : memref<8x512xf32, #tpu.memory_space<vmem>>, vector<8x128xf32>,
    %c0_8 = arith.constant 0 : index
    %c384_9 = arith.constant 384 : index
    %7 = vector.load %arg12[%c0_8, %c384_9] : memref<8x512xf32, #tpu.memory_space<vmem>>, vector<8x128xf32>
    tpu.vector_store %arg12[%c0_8, %c384_9], %5 {strides = array<i32>} : memref<8x512xf32, #tpu.memory_space<vmem>>, vector<8x128xf32>,
    %cst_10 = arith.constant 0.000000e+00 : f32
    %8 = vector.broadcast %cst_10 : f32 to vector<4x256xf32>
    %c4 = arith.constant 4 : index
    %c128 = arith.constant 128 : index
    %9 = vector.load %arg11[%c4, %c128] : memref<8x512xf32, #tpu.memory_space<vmem>>, vector<4x256xf32>
    tpu.vector_store %arg11[%c4, %c128], %8 {strides = array<i32>} : memref<8x512xf32, #tpu.memory_space<vmem>>, vector<4x256xf32>,
    %c0_11 = arith.constant 0 : index
    %c0_12 = arith.constant 0 : index
    %c0_13 = arith.constant 0 : index
    %10 = vector.load %arg1[%c0_11, %c0_12, %c0_13] : memref<1x4x256xf32, #tpu.memory_space<vmem>>, vector<1x4x256xf32>
    %11 = vector.shape_cast %10 : vector<1x4x256xf32> to vector<4x256xf32>
    %c0_14 = arith.constant 0 : index
    %c128_15 = arith.constant 128 : index
    %12 = vector.load %arg11[%c0_14, %c128_15] : memref<8x512xf32, #tpu.memory_space<vmem>>, vector<4x256xf32>
    tpu.vector_store %arg11[%c0_14, %c128_15], %11 {strides = array<i32>} : memref<8x512xf32, #tpu.memory_space<vmem>>, vector<4x256xf32>,
    %c0_16 = arith.constant 0 : index
    %c111 = arith.constant 111 : index
    %13 = vector.load %arg11[%c0_16, %c111] : memref<8x512xf32, #tpu.memory_space<vmem>>, vector<8x256xf32>
    %14 = vector.broadcast %0 : vector<1x256xf32> to vector<8x256xf32>
    %15 = arith.mulf %13, %14 : vector<8x256xf32>
    %c0_17 = arith.constant 0 : index
    %c112 = arith.constant 112 : index
    %16 = vector.load %arg11[%c0_17, %c112] : memref<8x512xf32, #tpu.memory_space<vmem>>, vector<8x256xf32>
    %c0_18 = arith.constant 0 : index
    %c113 = arith.constant 113 : index
    %17 = vector.load %arg11[%c0_18, %c113] : memref<8x512xf32, #tpu.memory_space<vmem>>, vector<8x256xf32>
    %18 = vector.broadcast %1 : vector<1x256xf32> to vector<8x256xf32>
    %19 = arith.mulf %17, %18 : vector<8x256xf32>
    %c0_19 = arith.constant 0 : index
    %c127 = arith.constant 127 : index
    %20 = vector.load %arg11[%c0_19, %c127] : memref<8x512xf32, #tpu.memory_space<vmem>>, vector<8x256xf32>
    %21 = vector.broadcast %0 : vector<1x256xf32> to vector<8x256xf32>
    %22 = arith.mulf %20, %21 : vector<8x256xf32>
    %c0_20 = arith.constant 0 : index
    %c128_21 = arith.constant 128 : index
    %23 = vector.load %arg11[%c0_20, %c128_21] : memref<8x512xf32, #tpu.memory_space<vmem>>, vector<8x256xf32>
    %c0_22 = arith.constant 0 : index
    %c129 = arith.constant 129 : index
    %24 = vector.load %arg11[%c0_22, %c129] : memref<8x512xf32, #tpu.memory_space<vmem>>, vector<8x256xf32>
    %25 = vector.broadcast %1 : vector<1x256xf32> to vector<8x256xf32>
    %26 = arith.mulf %24, %25 : vector<8x256xf32>
    %c0_23 = arith.constant 0 : index
    %c143 = arith.constant 143 : index
    %27 = vector.load %arg11[%c0_23, %c143] : memref<8x512xf32, #tpu.memory_space<vmem>>, vector<8x256xf32>
    %28 = vector.broadcast %0 : vector<1x256xf32> to vector<8x256xf32>
    %29 = arith.mulf %27, %28 : vector<8x256xf32>
    %c0_24 = arith.constant 0 : index
    %c144 = arith.constant 144 : index
    %30 = vector.load %arg11[%c0_24, %c144] : memref<8x512xf32, #tpu.memory_space<vmem>>, vector<8x256xf32>
    %c0_25 = arith.constant 0 : index
    %c145 = arith.constant 145 : index
    %31 = vector.load %arg11[%c0_25, %c145] : memref<8x512xf32, #tpu.memory_space<vmem>>, vector<8x256xf32>
    %32 = vector.broadcast %1 : vector<1x256xf32> to vector<8x256xf32>
    %33 = arith.mulf %31, %32 : vector<8x256xf32>
    %34 = tpu.concatenate %15, %16, %19, %22, %23, %26, %29, %30, %33 in 0 : vector<8x256xf32>, vector<8x256xf32>, vector<8x256xf32>, vector<8x256xf32>, vector<8x256xf32>, vector<8x256xf32>, vector<8x256xf32>, vector<8x256xf32>, vector<8x256xf32> -> vector<72x256xf32>
    %c0_26 = arith.constant 0 : index
    %c0_27 = arith.constant 0 : index
    %35 = vector.load %arg2[%c0_26, %c0_27] : memref<8x72xf32, #tpu.memory_space<vmem>>, vector<8x72xf32>
    %cst_28 = arith.constant dense<0.000000e+00> : vector<8x256xf32>
    %36 = tpu.matmul %35, %34, %cst_28 {dimension_numbers = #tpu.dot_dimension_numbers<[1], [0], [0], [1], [0, 0, 1, 1], [], []>} : vector<8x72xf32>, vector<72x256xf32>, vector<8x256xf32> -> vector<8x256xf32>
    %c0_29 = arith.constant 0 : index
    %c0_30 = arith.constant 0 : index
    %37 = vector.load %arg7[%c0_29, %c0_30] : memref<8x5xf32, #tpu.memory_space<vmem>>, vector<8x1xf32>
    %38 = vector.broadcast %37 : vector<8x1xf32> to vector<8x256xf32>
    %39 = arith.addf %36, %38 : vector<8x256xf32>
    %cst_31 = arith.constant 0.000000e+00 : f32
    %40 = vector.broadcast %cst_31 : f32 to vector<8x256xf32>
    %41 = arith.maximumf %39, %40 : vector<8x256xf32>
    %c0_32 = arith.constant 0 : index
    %c128_33 = arith.constant 128 : index
    %42 = vector.load %arg12[%c0_32, %c128_33] : memref<8x512xf32, #tpu.memory_space<vmem>>, vector<8x256xf32>
    tpu.vector_store %arg12[%c0_32, %c128_33], %41 {strides = array<i32>} : memref<8x512xf32, #tpu.memory_space<vmem>>, vector<8x256xf32>,
    %c0_34 = arith.constant 0 : index
    %c112_35 = arith.constant 112 : index
    %43 = vector.load %arg12[%c0_34, %c112_35] : memref<8x512xf32, #tpu.memory_space<vmem>>, vector<8x256xf32>
    %c0_36 = arith.constant 0 : index
    %c128_37 = arith.constant 128 : index
    %44 = vector.load %arg12[%c0_36, %c128_37] : memref<8x512xf32, #tpu.memory_space<vmem>>, vector<8x256xf32>
    %c0_38 = arith.constant 0 : index
    %c144_39 = arith.constant 144 : index
    %45 = vector.load %arg12[%c0_38, %c144_39] : memref<8x512xf32, #tpu.memory_space<vmem>>, vector<8x256xf32>
    %46 = tpu.concatenate %43, %44, %45 in 0 : vector<8x256xf32>, vector<8x256xf32>, vector<8x256xf32> -> vector<24x256xf32>
    %c0_40 = arith.constant 0 : index
    %c0_41 = arith.constant 0 : index
    %47 = vector.load %arg3[%c0_40, %c0_41] : memref<8x24xf32, #tpu.memory_space<vmem>>, vector<8x24xf32>
    %cst_42 = arith.constant dense<0.000000e+00> : vector<8x256xf32>
    %48 = tpu.matmul %47, %46, %cst_42 {dimension_numbers = #tpu.dot_dimension_numbers<[1], [0], [0], [1], [0, 0, 1, 1], [], []>} : vector<8x24xf32>, vector<24x256xf32>, vector<8x256xf32> -> vector<8x256xf32>
    %c0_43 = arith.constant 0 : index
    %c1_44 = arith.constant 1 : index
    %49 = vector.load %arg7[%c0_43, %c1_44] : memref<8x5xf32, #tpu.memory_space<vmem>>, vector<8x1xf32>
    %50 = vector.broadcast %49 : vector<8x1xf32> to vector<8x256xf32>
    %51 = arith.addf %48, %50 : vector<8x256xf32>
    %cst_45 = arith.constant 0.000000e+00 : f32
    %52 = vector.broadcast %cst_45 : f32 to vector<8x256xf32>
    %53 = arith.maximumf %51, %52 : vector<8x256xf32>
    %c0_46 = arith.constant 0 : index
    %c128_47 = arith.constant 128 : index
    %54 = vector.load %arg12[%c0_46, %c128_47] : memref<8x512xf32, #tpu.memory_space<vmem>>, vector<8x256xf32>
    tpu.vector_store %arg12[%c0_46, %c128_47], %53 {strides = array<i32>} : memref<8x512xf32, #tpu.memory_space<vmem>>, vector<8x256xf32>,
    %c0_48 = arith.constant 0 : index
    %c127_49 = arith.constant 127 : index
    %55 = vector.load %arg12[%c0_48, %c127_49] : memref<8x512xf32, #tpu.memory_space<vmem>>, vector<8x256xf32>
    %56 = vector.broadcast %0 : vector<1x256xf32> to vector<8x256xf32>
    %57 = arith.mulf %55, %56 : vector<8x256xf32>
    %c0_50 = arith.constant 0 : index
    %c128_51 = arith.constant 128 : index
    %58 = vector.load %arg12[%c0_50, %c128_51] : memref<8x512xf32, #tpu.memory_space<vmem>>, vector<8x256xf32>
    %c0_52 = arith.constant 0 : index
    %c129_53 = arith.constant 129 : index
    %59 = vector.load %arg12[%c0_52, %c129_53] : memref<8x512xf32, #tpu.memory_space<vmem>>, vector<8x256xf32>
    %60 = vector.broadcast %1 : vector<1x256xf32> to vector<8x256xf32>
    %61 = arith.mulf %59, %60 : vector<8x256xf32>
    %62 = tpu.concatenate %57, %58, %61 in 0 : vector<8x256xf32>, vector<8x256xf32>, vector<8x256xf32> -> vector<24x256xf32>
    %c0_54 = arith.constant 0 : index
    %c0_55 = arith.constant 0 : index
    %63 = vector.load %arg4[%c0_54, %c0_55] : memref<8x24xf32, #tpu.memory_space<vmem>>, vector<8x24xf32>
    %cst_56 = arith.constant dense<0.000000e+00> : vector<8x256xf32>
    %64 = tpu.matmul %63, %62, %cst_56 {dimension_numbers = #tpu.dot_dimension_numbers<[1], [0], [0], [1], [0, 0, 1, 1], [], []>} : vector<8x24xf32>, vector<24x256xf32>, vector<8x256xf32> -> vector<8x256xf32>
    %c0_57 = arith.constant 0 : index
    %c2 = arith.constant 2 : index
    %65 = vector.load %arg7[%c0_57, %c2] : memref<8x5xf32, #tpu.memory_space<vmem>>, vector<8x1xf32>
    %66 = vector.broadcast %65 : vector<8x1xf32> to vector<8x256xf32>
    %67 = arith.addf %64, %66 : vector<8x256xf32>
    %cst_58 = arith.constant 0.000000e+00 : f32
    %68 = vector.broadcast %cst_58 : f32 to vector<8x256xf32>
    %69 = arith.maximumf %67, %68 : vector<8x256xf32>
    %c0_59 = arith.constant 0 : index
    %c128_60 = arith.constant 128 : index
    %70 = vector.load %arg12[%c0_59, %c128_60] : memref<8x512xf32, #tpu.memory_space<vmem>>, vector<8x256xf32>
    tpu.vector_store %arg12[%c0_59, %c128_60], %69 {strides = array<i32>} : memref<8x512xf32, #tpu.memory_space<vmem>>, vector<8x256xf32>,
    %c0_61 = arith.constant 0 : index
    %c112_62 = arith.constant 112 : index
    %71 = vector.load %arg12[%c0_61, %c112_62] : memref<8x512xf32, #tpu.memory_space<vmem>>, vector<8x256xf32>
    %c0_63 = arith.constant 0 : index
    %c128_64 = arith.constant 128 : index
    %72 = vector.load %arg12[%c0_63, %c128_64] : memref<8x512xf32, #tpu.memory_space<vmem>>, vector<8x256xf32>
    %c0_65 = arith.constant 0 : index
    %c144_66 = arith.constant 144 : index
    %73 = vector.load %arg12[%c0_65, %c144_66] : memref<8x512xf32, #tpu.memory_space<vmem>>, vector<8x256xf32>
    %74 = tpu.concatenate %71, %72, %73 in 0 : vector<8x256xf32>, vector<8x256xf32>, vector<8x256xf32> -> vector<24x256xf32>
    %c0_67 = arith.constant 0 : index
    %c0_68 = arith.constant 0 : index
    %75 = vector.load %arg5[%c0_67, %c0_68] : memref<8x24xf32, #tpu.memory_space<vmem>>, vector<8x24xf32>
    %cst_69 = arith.constant dense<0.000000e+00> : vector<8x256xf32>
    %76 = tpu.matmul %75, %74, %cst_69 {dimension_numbers = #tpu.dot_dimension_numbers<[1], [0], [0], [1], [0, 0, 1, 1], [], []>} : vector<8x24xf32>, vector<24x256xf32>, vector<8x256xf32> -> vector<8x256xf32>
    %c0_70 = arith.constant 0 : index
    %c3 = arith.constant 3 : index
    %77 = vector.load %arg7[%c0_70, %c3] : memref<8x5xf32, #tpu.memory_space<vmem>>, vector<8x1xf32>
    %78 = vector.broadcast %77 : vector<8x1xf32> to vector<8x256xf32>
    %79 = arith.addf %76, %78 : vector<8x256xf32>
    %cst_71 = arith.constant 0.000000e+00 : f32
    %80 = vector.broadcast %cst_71 : f32 to vector<8x256xf32>
    %81 = arith.maximumf %79, %80 : vector<8x256xf32>
    %c0_72 = arith.constant 0 : index
    %c128_73 = arith.constant 128 : index
    %82 = vector.load %arg12[%c0_72, %c128_73] : memref<8x512xf32, #tpu.memory_space<vmem>>, vector<8x256xf32>
    tpu.vector_store %arg12[%c0_72, %c128_73], %81 {strides = array<i32>} : memref<8x512xf32, #tpu.memory_space<vmem>>, vector<8x256xf32>,
    %c0_74 = arith.constant 0 : index
    %c127_75 = arith.constant 127 : index
    %83 = vector.load %arg12[%c0_74, %c127_75] : memref<8x512xf32, #tpu.memory_space<vmem>>, vector<8x256xf32>
    %84 = vector.broadcast %0 : vector<1x256xf32> to vector<8x256xf32>
    %85 = arith.mulf %83, %84 : vector<8x256xf32>
    %c0_76 = arith.constant 0 : index
    %c128_77 = arith.constant 128 : index
    %86 = vector.load %arg12[%c0_76, %c128_77] : memref<8x512xf32, #tpu.memory_space<vmem>>, vector<8x256xf32>
    %c0_78 = arith.constant 0 : index
    %c129_79 = arith.constant 129 : index
    %87 = vector.load %arg12[%c0_78, %c129_79] : memref<8x512xf32, #tpu.memory_space<vmem>>, vector<8x256xf32>
    %88 = vector.broadcast %1 : vector<1x256xf32> to vector<8x256xf32>
    %89 = arith.mulf %87, %88 : vector<8x256xf32>
    %90 = tpu.concatenate %85, %86, %89 in 0 : vector<8x256xf32>, vector<8x256xf32>, vector<8x256xf32> -> vector<24x256xf32>
    %c0_80 = arith.constant 0 : index
    %c0_81 = arith.constant 0 : index
    %91 = vector.load %arg6[%c0_80, %c0_81] : memref<8x24xf32, #tpu.memory_space<vmem>>, vector<8x24xf32>
    %cst_82 = arith.constant dense<0.000000e+00> : vector<8x256xf32>
    %92 = tpu.matmul %91, %90, %cst_82 {dimension_numbers = #tpu.dot_dimension_numbers<[1], [0], [0], [1], [0, 0, 1, 1], [], []>} : vector<8x24xf32>, vector<24x256xf32>, vector<8x256xf32> -> vector<8x256xf32>
    %c0_83 = arith.constant 0 : index
    %c4_84 = arith.constant 4 : index
    %93 = vector.load %arg7[%c0_83, %c4_84] : memref<8x5xf32, #tpu.memory_space<vmem>>, vector<8x1xf32>
    %94 = vector.broadcast %93 : vector<8x1xf32> to vector<8x256xf32>
    %95 = arith.addf %92, %94 : vector<8x256xf32>
    %96 = arith.addf %95, %41 : vector<8x256xf32>
    %cst_85 = arith.constant 0.000000e+00 : f32
    %97 = vector.broadcast %cst_85 : f32 to vector<8x256xf32>
    %98 = arith.maximumf %96, %97 : vector<8x256xf32>
    %c0_86 = arith.constant 0 : index
    %c0_87 = arith.constant 0 : index
    %99 = vector.load %arg9[%c0_86, %c0_87] : memref<256x1024xbf16, #tpu.memory_space<vmem>>, vector<256x1024xbf16>
    %100 = arith.extf %99 : vector<256x1024xbf16> to vector<256x1024xf32>
    %cst_88 = arith.constant dense<0.000000e+00> : vector<8x1024xf32>
    %101 = tpu.matmul %98, %100, %cst_88 {dimension_numbers = #tpu.dot_dimension_numbers<[1], [0], [0], [1], [0, 0, 1, 1], [], []>} : vector<8x256xf32>, vector<256x1024xf32>, vector<8x1024xf32> -> vector<8x1024xf32>
    %c0_89 = arith.constant 0 : index
    %c0_90 = arith.constant 0 : index
    %c0_91 = arith.constant 0 : index
    %102 = vector.load %arg10[%c0_89, %c0_90, %c0_91] : memref<1x8x1024xf32, #tpu.memory_space<vmem>>, vector<1x8x1024xf32>
    %103 = vector.shape_cast %102 : vector<1x8x1024xf32> to vector<8x1024xf32>
    %104 = vector.shape_cast %101 : vector<8x1024xf32> to vector<1x8x1024xf32>
    tpu.vector_store %arg10[%c0_89, %c0_90, %c0_91], %104 {strides = array<i32>} : memref<1x8x1024xf32, #tpu.memory_space<vmem>>, vector<1x8x1024xf32>,
    return
  }
  func.func @transform_0(%arg0: i32) -> (i32, i32, i32) {
    %c0_i32 = arith.constant 0 : i32
    %c0_i32_0 = arith.constant 0 : i32
    %c0_i32_1 = arith.constant 0 : i32
    return %arg0, %c0_i32, %c0_i32_0 : i32, i32, i32
  }
  func.func @transform_1(%arg0: i32) -> (i32, i32) {
    %c0_i32 = arith.constant 0 : i32
    %c0_i32_0 = arith.constant 0 : i32
    %c0_i32_1 = arith.constant 0 : i32
    return %c0_i32, %c0_i32_0 : i32, i32
  }
  func.func @transform_2(%arg0: i32) -> (i32, i32) {
    %c0_i32 = arith.constant 0 : i32
    %c0_i32_0 = arith.constant 0 : i32
    %c0_i32_1 = arith.constant 0 : i32
    return %c0_i32, %c0_i32_0 : i32, i32
  }
  func.func @transform_3(%arg0: i32) -> (i32, i32) {
    %c0_i32 = arith.constant 0 : i32
    %c0_i32_0 = arith.constant 0 : i32
    %c0_i32_1 = arith.constant 0 : i32
    return %c0_i32, %c0_i32_0 : i32, i32
  }
  func.func @transform_4(%arg0: i32) -> (i32, i32) {
    %c0_i32 = arith.constant 0 : i32
    %c0_i32_0 = arith.constant 0 : i32
    %c0_i32_1 = arith.constant 0 : i32
    return %c0_i32, %c0_i32_0 : i32, i32
  }
  func.func @transform_5(%arg0: i32) -> (i32, i32) {
    %c0_i32 = arith.constant 0 : i32
    %c0_i32_0 = arith.constant 0 : i32
    %c0_i32_1 = arith.constant 0 : i32
    return %c0_i32, %c0_i32_0 : i32, i32
  }
  func.func @transform_6(%arg0: i32) -> (i32, i32) {
    %c0_i32 = arith.constant 0 : i32
    %c0_i32_0 = arith.constant 0 : i32
    %c0_i32_1 = arith.constant 0 : i32
    return %c0_i32, %c0_i32_0 : i32, i32
  }
  func.func @transform_7(%arg0: i32) -> (i32, i32) {
    %c0_i32 = arith.constant 0 : i32
    %c0_i32_0 = arith.constant 0 : i32
    %c0_i32_1 = arith.constant 0 : i32
    return %c0_i32, %c0_i32_0 : i32, i32
  }
  func.func @transform_8(%arg0: i32) -> (i32, i32) {
    %c0_i32 = arith.constant 0 : i32
    %c0_i32_0 = arith.constant 0 : i32
    %c0_i32_1 = arith.constant 0 : i32
    return %c0_i32, %c0_i32_0 : i32, i32
  }
  func.func @transform_9(%arg0: i32) -> (i32, i32, i32) {
    %c0_i32 = arith.constant 0 : i32
    %c0_i32_0 = arith.constant 0 : i32
    %c0_i32_1 = arith.constant 0 : i32
    return %arg0, %c0_i32, %c0_i32_0 : i32, i32, i32
  }
}

</mosaic_0001>

<bundles_post_ra>
// kernel: decoder_thermal_module_forward.1
= control target key start
LH: loop header
LB: loop body
LE: loop exit
PB: predicated region body
PF: predicated region fallthrough
CT: control target
= control target key end

     0   :  { %s2740_s30 = smov 0   ;;  %s3399_s0 = inlined_call_operand.vmem [shape: f32[2,4,256], index: 0, kind: input, shape index: {}]   ;;  %s3400_s1 = inlined_call_operand.vmem [shape: f32[8,72], index: 1, kind: input, shape index: {}]   ;;  %s3401_s2 = inlined_call_operand.vmem [shape: f32[8,24], index: 2, kind: input, shape index: {}]   ;;  %s3402_s3 = inlined_call_operand.vmem [shape: f32[8,24], index: 3, kind: input, shape index: {}]   ;;  %s3403_s4 = inlined_call_operand.vmem [shape: f32[8,24], index: 4, kind: input, shape index: {}]   ;;  %s3404_s5 = inlined_call_operand.vmem [shape: f32[8,24], index: 5, kind: input, shape index: {}]   ;;  %s3405_s6 = inlined_call_operand.vmem [shape: f32[8,5], index: 6, kind: input, shape index: {}]   ;;  %s3406_s7 = inlined_call_operand.vmem [shape: f32[2,256], index: 7, kind: input, shape index: {}]   ;;  %s3407_s8 = inlined_call_operand.vmem [shape: bf16[256,1024], index: 8, kind: input, shape index: {}]   ;;  %s3408_s9 = inlined_call_operand.vmem [shape: f32[2,8,1024], index: 9, kind: output, shape index: {}]  }
   0x1 LB: > { %s2020_s10 = sadd.s32 4294967295, %s2669_s30   ;;  %p2024_p0 = scmp.ge.s32.totalorder %s2669_s30, 1  ;;  %s2669_s30 = sphi %s2740_s30, %s19_s30  }
   0x2   : > { %p287_p1 = scmp.lt.s32.totalorder %s2669_s30, 3 }
   0x4   : > { %p288_p2 = pnand %p2024_p0, %p287_p1 }
   0x5   : > { %v352_v0 = vlaneseq (!%p288_p2)  ;;  %v2671_v1 = vmov (!%p288_p2), 0.0   ;;  %v2029_v2 = vld [vmem:[%s3406_s7 + $0x1] ss:$2 sm:$0x3] (!%p288_p2)  ;;  %p323_p3 = scmp.lt.s32.totalorder (!%p288_p2), %s2020_s10, 1  ;;  %s2672_s16 = smov (!%p288_p2), 113  }
   0x6   : > { %291 = sbr.rel (%p288_p2) target bundleno = 2761 (0xac9), region = 56  ;;  %340 = vst [vmem:[#allocation2 + $0x8] sm:$0xf0] (!%p288_p2), %v2671_v1  ;;  %341 = vst [vmem:[#allocation2 + $0x10] sm:$0xf0] (!%p288_p2), %v2671_v1  ;;  %700 = vmatprep.mubr.f32.mxu0 (!%p288_p2), %v2671_v1  ;;  %842 = vmatprep.mubr.f32.mxu1 (!%p288_p2), %v2671_v1  ;;  %s2673_s17 = smov (!%p288_p2), 127  }
   0x7   : > { %v353_v3 = vshrl.u32 (!%p288_p2), %v352_v0, 7  ;;  %v333_v4 = vld [vmem:[%s3406_s7] ss:$2 sm:$0x3] (!%p288_p2)  ;;  %s2674_s21 = smov (!%p288_p2), 1   ;;  %s2675_s22 = smov (!%p288_p2), 15  }
   0x8   : > { %s2676_s23 = smov (!%p288_p2), 17   ;;  %s2677_s24 = smov (!%p288_p2), 111   ;;  %vm397_vm0 = vcmask (!%p288_p2), 1039360   ;;  %vm385_vm1 = vcmask (!%p288_p2), 924672   ;;  %vm412_vm2 = vcmask (!%p288_p2), 7168   ;;  %vm424_vm3 = vcmask (!%p288_p2), 121856  }
   0x9   : > { %v354_v5 = vsub.s32 (!%p288_p2), 0, %v353_v3  ;;  %v358_v6 = vsub.s32 (!%p288_p2), 1, %v353_v3  ;;  %s2678_s25 = smov (!%p288_p2), 112   ;;  %s2679_s26 = smov (!%p288_p2), 126   ;;  %vm436_vm4 = vcmask (!%p288_p2), 138240   ;;  %vm364_vm5 = vcmask (!%p288_p2), 908288  }
   0xa   : > { %s2680_s27 = smov (!%p288_p2), 95   ;;  %s2681_s28 = smov (!%p288_p2), 110   ;;  %vm476_vm6 = vcmask (!%p288_p2), 916480   ;;  %vm464_vm7 = vcmask (!%p288_p2), 1031168   ;;  %vm517_vm8 = vcmask (!%p288_p2), 777216   ;;  %vm493_vm9 = vcmask (!%p288_p2), 900096  }
   0xb   : > { %v376_v7 = vrot.slane (!%p288_p2), %v2029_v2, %v354_v5  ;;  %v355_v8 = vrot.slane (!%p288_p2), %v333_v4, %v354_v5  ;;  %v380_v9 = vrot.slane (!%p288_p2), %v2029_v2, %v358_v6  ;;  %v359_v10 = vrot.slane (!%p288_p2), %v333_v4, %v358_v6  ;;  %s2682_s29 = smov (!%p288_p2), 96   ;;  %s2683_s11 = smov (!%p288_p2), 94  }
   0xc   : > { %vm505_vm10 = vcmask (!%p288_p2), 785408   ;;  %vm529_vm11 = vcmask (!%p288_p2), 769024   ;;  %vm632_vm12 = vcmask (!%p288_p2), 588800   ;;  %vm761_vm13 = vcmask (!%p288_p2), 130048  }
   0xd   : > { %s3410_s10 = smov (!%p323_p3, %s2020_s10), 1  ;;  %381 = vrot.lane.b32.xlu0 %v376_v7, %s2672_s16  ;;  %393 = vrot.lane.b32.xlu1 %v355_v8, %s2673_s17  ;;  %vm774_vm14 = vcmask 195584  }
   0xe   : > { %s2037_s15 = sshll.u32 %s3410_s10, 3 }
   0xf   : > { %s327_s20 = scalar_lea.vmem %s3399_s0, %s2037_s15 }
  0x10   : > { %v342_v11 = vld [vmem:[%s327_s20] sm:$0xff] }
  0x11   : > { %v344_v12 = vcombine.high %v342_v11, %v342_v11  ;;  %346 = vst [vmem:[#allocation2 + $0x8] sm:$0xf] %v342_v11  ;;  %383 = vrot.lane.b32.xlu0 %v380_v9, %s2672_s16  ;;  %395 = vrot.lane.b32.xlu1 %v359_v10, %s2673_s17  ;;  %s2685_s16 = smov 16  }
  0x13   : > { %347 = vst [vmem:[#allocation2 + $0x10] sm:$0xf] %v344_v12 }
  0x15   : > { %408 = vrot.lane.b32.xlu0 %v376_v7, %s2674_s21  ;;  %410 = vrot.lane.b32.xlu1 %v380_v9, %s2674_s21 }
  0x18   : > { %v2770_v13 = vld [vmem:[#allocation2 + $0x8] sm:$0xff] }
  0x19   : > { %420 = vrot.lane.b32.xlu0 %v355_v8, %s2675_s22  ;;  %422 = vrot.lane.b32.xlu1 %v359_v10, %s2675_s22 }
  0x1a   : > { %v2772_v14 = vld [vmem:[#allocation2 + $0x10] sm:$0xff] }
  0x1b   : > { %v2482_v15 = vpack.i.bf16 %v2772_v14, %v2770_v13 }
  0x1d   : > { %432 = vrot.lane.b32.xlu0 %v376_v7, %s2676_s23  ;;  %434 = vrot.lane.b32.xlu1 %v380_v9, %s2676_s23 }
  0x21   : > { %360 = vrot.lane.b32.xlu0 %v355_v8, %s2677_s24  ;;  %362 = vrot.lane.b32.xlu1 %v359_v10, %s2677_s24 }
  0x25   : > { %2483 = vrot.lane.b32.xlu0 %v2482_v15, %s2673_s17  ;;  %447 = vrot.lane.b32.xlu1 %v2671_v1, %s2673_s17 }
  0x29   : > { %2488 = vrot.lane.b32.xlu0 %v2482_v15, %s2677_s24 }
  0x7f   : > { %v382_v16 = vpop.permute.xlu0 %381  ;;  %v394_v17 = vpop.permute.xlu1 %393 }
  0x80   : > { %v390_v18 = vmul.f32 0.0, %v382_v16  ;;  %v2779_v19 = vmul.f32 0.0, %v394_v17 }
  0x82   : > { %470 = vrot.lane.b32.xlu1 %v2779_v19, %s2678_s25  ;;  %458 = vrot.lane.b32.xlu0 %v390_v18, %s2679_s26 }
  0x83   : > { %v384_v20 = vpop.permute.xlu0 %383  ;;  %v2784_v21 = vpop.permute.xlu1 %395 }
  0x84   : > { %v2788_v22 = vsel %vm397_vm0, %v394_v17, %v2784_v21  ;;  %v404_v23 = vmul.f32 %v2784_v21, %v2772_v14  ;;  %v386_v24 = vsel %vm385_vm1, %v382_v16, %v384_v20  ;;  %v392_v26 = vmul.f32 %v384_v20, %v2772_v14 }
  0x85   : > { %v403_v25 = vmul.f32 %v2788_v22, %v2770_v13  ;;  %v391_v30 = vmul.f32 %v386_v24, %v2770_v13 }
  0x86   : > { %2498 = vrot.lane.b32.xlu1 %v2482_v15, %s2680_s27 }
  0x87   : > { %v2796_v27 = vpop.permute.xlu0 %408  ;;  %v411_v28 = vpop.permute.xlu1 %410  ;;  %v2502_v29 = vpack.i.bf16 %v404_v23, %v403_v25  ;;  %v2492_v38 = vpack.i.bf16 %v392_v26, %v391_v30 }
  0x88   : > { %v417_v31 = vmul.f32 %v2796_v27, %v2770_v13  ;;  %v2803_v32 = vsel %vm412_vm2, %v2796_v27, %v411_v28  ;;  %v2805_v33 = vmul.f32 0.0, %v411_v28 }
  0x89   : > { %v418_v34 = vmul.f32 %v2803_v32, %v2772_v14 }
  0x8a   : > { %491 = vrot.lane.b32.xlu0 %v2805_v33, %s2681_s28  ;;  %2503 = vrot.lane.b32.xlu1 %v2502_v29, %s2678_s25 }
  0x8b   : > { %v421_v35 = vpop.permute.xlu0 %420  ;;  %v423_v36 = vpop.permute.xlu1 %422  ;;  %v2507_v37 = vpack.i.bf16 %v418_v34, %v417_v31 }
  0x8c   : > { %v429_v39 = vmul.f32 %v421_v35, %v2770_v13  ;;  %v425_v40 = vsel %vm424_vm3, %v421_v35, %v423_v36  ;;  %v431_v42 = vmul.f32 0.0, %v423_v36 }
  0x8d   : > { %v430_v41 = vmul.f32 %v425_v40, %v2772_v14 }
  0x8e   : > { %2508 = vrot.lane.b32.xlu1 %v2507_v37, %s2681_s28  ;;  %2493 = vrot.lane.b32.xlu0 %v2492_v38, %s2679_s26 }
  0x8f   : > { %v2512_v43 = vpack.i.bf16 %v430_v41, %v429_v39  ;;  %v433_v44 = vpop.permute.xlu0 %432  ;;  %v435_v45 = vpop.permute.xlu1 %434 }
  0x90   : > { %v441_v46 = vmul.f32 %v433_v44, %v2770_v13  ;;  %v437_v47 = vsel %vm436_vm4, %v433_v44, %v435_v45  ;;  %v443_v51 = vmul.f32 0.0, %v435_v45 }
  0x91   : > { %v442_v52 = vmul.f32 %v437_v47, %v2772_v14 }
  0x92   : > { %2513 = vrot.lane.b32.xlu1 %v2512_v43, %s2682_s29  ;;  %503 = vrot.lane.b32.xlu0 %v431_v42, %s2682_s29 }
  0x93   : > { %v361_v48 = vpop.permute.xlu0 %360  ;;  %v363_v49 = vpop.permute.xlu1 %362 }
  0x94   : > { %v365_v50 = vsel %vm364_vm5, %v361_v48, %v363_v49  ;;  %v371_v54 = vmul.f32 %v363_v49, %v2772_v14  ;;  %v369_v59 = vmul.f32 0.0, %v361_v48 }
  0x95   : > { %v370_v53 = vmul.f32 %v365_v50, %v2770_v13 }
  0x96   : > { %515 = vrot.lane.b32.xlu0 %v2671_v1, %s2680_s27  ;;  %523 = vrot.lane.b32.xlu1 %v441_v46, %s2683_s11 }
  0x97   : > { %v2484_v55 = vpop.permute.xlu0 %2483  ;;  %v448_v58 = vpop.permute.xlu1 %447  ;;  %v2517_v60 = vpack.i.bf16 %v371_v54, %v370_v53 }
  0x98   : > { %v2486_v56 = vunpack.i.h.bf16 %v2484_v55  ;;  %v2485_v57 = vunpack.i.l.bf16 %v2484_v55 }
  0x9a   : > { %525 = vrot.lane.b32.xlu0 %v442_v52, %s2683_s11  ;;  %527 = vrot.lane.b32.xlu1 %v443_v51, %s2683_s11  ;;  %v454_v61 = vsel %vm397_vm0, %v2485_v57, %v2486_v56  ;;  %v453_v63 = vsel %vm397_vm0, %v448_v58, %v2485_v57 }
  0x9b   : > { %v2527_v62 = vpack.i.bf16 %v2486_v56, %v454_v61  ;;  %v2489_v0 = vpop.permute.xlu0 %2488  ;;  %v2522_v4 = vpack.i.bf16 %v453_v63, %v369_v59 }
  0x9c   : > { %v2491_v2 = vunpack.i.h.bf16 %v2489_v0  ;;  %v2490_v3 = vunpack.i.l.bf16 %v2489_v0 }
  0x9e   : > { %2518 = vrot.lane.b32.xlu0 %v2517_v60, %s2676_s23  ;;  %2528 = vrot.lane.b32.xlu1 %v2527_v62, %s2676_s23  ;;  %v483_v5 = vsel %vm364_vm5, %v2490_v3, %v2491_v2 }
  0x9f   : > { %v2532_v6 = vpack.i.bf16 %v2491_v2, %v483_v5  ;;  %v2684_v2 = vmov 0  }
  0xa0   : > { %2577 = vset.pattern.permute.xlu1 %v2684_v2  ;;  %v532_v2 = vld [vmem:[%s3400_s1] sm:$0xff] }
  0xa2   : > { %2523 = vrot.lane.b32.xlu0 %v2522_v4, %s2676_s23 }
  0xa6   : > { %2533 = vrot.lane.b32.xlu0 %v2532_v6, %s2676_s23 }
  0xf4   : > { %v471_v7 = vpop.permute.xlu1 %470  ;;  %v459_v8 = vpop.permute.xlu0 %458 }
  0xf8   : > { %v2499_v9 = vpop.permute.xlu1 %2498 }
  0xf9   : > { %v2501_v26 = vunpack.i.h.bf16 %v2499_v9  ;;  %v2500_v28 = vunpack.i.l.bf16 %v2499_v9  ;;  %v2857_v9 = vld [vmem:[%s3405_s6] sm:$0xff] }
  0xfb   : > { %v518_v37 = vsel %vm517_vm8, %v2500_v28, %v2501_v26 }
  0xfc   : > { %v492_v10 = vpop.permute.xlu0 %491  ;;  %v2504_v11 = vpop.permute.xlu1 %2503 }
  0xfd   : > { %v2506_v12 = vunpack.i.h.bf16 %v2504_v11  ;;  %v2505_v13 = vunpack.i.l.bf16 %v2504_v11 }
  0xff   : > { %v478_v14 = vsel %vm476_vm6, %v2505_v13, %v2506_v12  ;;  %v477_v36 = vsel %vm476_vm6, %v471_v7, %v2505_v13 }
 0x100   : > { %v2542_v15 = vpack.i.bf16 %v2506_v12, %v478_v14  ;;  %v2509_v16 = vpop.permute.xlu1 %2508  ;;  %v2494_v17 = vpop.permute.xlu0 %2493 }
 0x101   : > { %v2510_v18 = vunpack.i.l.bf16 %v2509_v16  ;;  %v2496_v20 = vunpack.i.h.bf16 %v2494_v17  ;;  %v2495_v23 = vunpack.i.l.bf16 %v2494_v17  ;;  %v2511_v34 = vunpack.i.h.bf16 %v2509_v16 }
 0x102   : > { %2543 = vrot.lane.b32.xlu0 %v2542_v15, %s2676_s23 }
 0x103   : > { %v2547_v24 = vpack.i.bf16 %v2510_v18, %v2490_v3  ;;  %v466_v25 = vsel %vm464_vm7, %v2495_v23, %v2496_v20  ;;  %v465_v35 = vsel %vm464_vm7, %v459_v8, %v2495_v23  ;;  %v494_v43 = vsel %vm493_vm9, %v2510_v18, %v2511_v34 }
 0x104   : > { %v2537_v29 = vpack.i.bf16 %v2496_v20, %v466_v25  ;;  %v2514_v30 = vpop.permute.xlu1 %2513  ;;  %v504_v31 = vpop.permute.xlu0 %503  ;;  %v2557_v39 = vpack.i.bf16 %v477_v36, %v465_v35  ;;  %v495_v44 = vsel %vm493_vm9, %v2511_v34, %v492_v10 }
 0x105   : > { %v2516_v41 = vunpack.i.h.bf16 %v2514_v30  ;;  %v2515_v46 = vunpack.i.l.bf16 %v2514_v30  ;;  %v2562_v47 = vpack.i.bf16 %v495_v44, %v494_v43 }
 0x106   : > { %2538 = vrot.lane.b32.xlu1 %v2537_v29, %s2676_s23  ;;  %2548 = vrot.lane.b32.xlu0 %v2547_v24, %s2676_s23 }
 0x107   : > { %v506_v50 = vsel %vm505_vm10, %v2515_v46, %v2516_v41  ;;  %v507_v51 = vsel %vm505_vm10, %v2516_v41, %v504_v31  ;;  %v2572_v62 = vpack.i.bf16 %v2500_v28, %v2515_v46 }
 0x108   : > { %v516_v38 = vpop.permute.xlu0 %515  ;;  %v524_v40 = vpop.permute.xlu1 %523  ;;  %v2567_v53 = vpack.i.bf16 %v507_v51, %v506_v50 }
 0x109   : > { %v519_v42 = vsel %vm517_vm8, %v2501_v26, %v516_v38 }
 0x10a   : > { %v2552_v45 = vpack.i.bf16 %v519_v42, %v518_v37  ;;  %2558 = vrot.lane.b32.xlu1 %v2557_v39, %s2676_s23 }
 0x10c   : > { %2553 = vrot.lane.b32.xlu0 %v2552_v45, %s2676_s23  ;;  %v526_v48 = vpop.permute.xlu0 %525  ;;  %v528_v49 = vpop.permute.xlu1 %527 }
 0x10d   : > { %v530_v52 = vsel %vm529_vm11, %v524_v40, %v526_v48  ;;  %v531_v5 = vsel %vm529_vm11, %v526_v48, %v528_v49 }
 0x10e   : > { %2563 = vrot.lane.b32.xlu1 %v2562_v47, %s2676_s23 }
 0x110   : > { %592 = vrot.lane.b32.xlu0 %v530_v52, %s2676_s23  ;;  %v2519_v54 = vpop.permute.xlu0 %2518  ;;  %v2529_v55 = vpop.permute.xlu1 %2528 }
 0x111   : > { %v2521_v56 = vunpack.i.h.bf16 %v2519_v54  ;;  %v2520_v57 = vunpack.i.l.bf16 %v2519_v54  ;;  %v2531_v58 = vunpack.i.h.bf16 %v2529_v55  ;;  %v2530_v59 = vunpack.i.l.bf16 %v2529_v55 }
 0x112   : > { %2568 = vrot.lane.b32.xlu1 %v2567_v53, %s2676_s23 }
 0x113   : > { %v597_v60 = vsel %vm436_vm4, %v2520_v57, %v2521_v56  ;;  %v599_v61 = vsel %vm436_vm4, %v2530_v59, %v2531_v58 }
 0x114   : > { %590 = vrot.lane.b32.xlu0 %v524_v40, %s2676_s23  ;;  %v2524_v63 = vpop.permute.xlu0 %2523  ;;  %v2039_v0 = vpack.c.bf16 %v599_v61, %v597_v60 }
 0x115   : > { %v2526_v3 = vunpack.i.h.bf16 %v2524_v63  ;;  %v2525_v4 = vunpack.i.l.bf16 %v2524_v63 }
 0x116   : > { %2573 = vrot.lane.b32.xlu1 %v2572_v62, %s2676_s23  ;;  %2040 = vmatprep.subr.bf16.mxu0 %v2039_v0 }
 0x117   : > { %v596_v6 = vsel %vm436_vm4, %v2525_v4, %v2520_v57  ;;  %v598_v7 = vsel %vm436_vm4, %v2526_v3, %v2530_v59 }
 0x118   : > { %v2041_v8 = vpack.c.bf16 %v598_v7, %v596_v6  ;;  %v2534_v10 = vpop.permute.xlu0 %2533 }
 0x119   : > { %v2536_v28 = vunpack.i.h.bf16 %v2534_v10  ;;  %v2535_v29 = vunpack.i.l.bf16 %v2534_v10 }
 0x11a   : > { %594 = vrot.lane.b32.xlu1 %v531_v5, %s2676_s23  ;;  %2042 = vmatpush1.bf16.msra.mxu0 %v2041_v8 }
 0x11b   : > { %v605_v41 = vsel %vm436_vm4, %v2535_v29, %v2536_v28 }
 0x11e   : > { %536 = vperm.xlu1 %2577, %v2857_v9  }
 0x174   : > { %v2544_v11 = vpop.permute.xlu0 %2543 }
 0x175   : > { %v2546_v12 = vunpack.i.h.bf16 %v2544_v11  ;;  %v2545_v13 = vunpack.i.l.bf16 %v2544_v11 }
 0x177   : > { %v603_v20 = vsel %vm436_vm4, %v2545_v13, %v2546_v12 }
 0x178   : > { %v2539_v14 = vpop.permute.xlu1 %2538  ;;  %v2549_v17 = vpop.permute.xlu0 %2548 }
 0x179   : > { %v2541_v15 = vunpack.i.h.bf16 %v2539_v14  ;;  %v2540_v16 = vunpack.i.l.bf16 %v2539_v14  ;;  %v2550_v30 = vunpack.i.l.bf16 %v2549_v17  ;;  %v2551_v38 = vunpack.i.h.bf16 %v2549_v17 }
 0x17b   : > { %v601_v18 = vsel %vm436_vm4, %v2540_v16, %v2541_v15  ;;  %v604_v42 = vsel %vm436_vm4, %v2550_v30, %v2535_v29 }
 0x17c   : > { %v2559_v23 = vpop.permute.xlu1 %2558  ;;  %v2043_v24 = vpack.c.bf16 %v603_v20, %v601_v18 }
 0x17d   : > { %v2561_v25 = vunpack.i.h.bf16 %v2559_v23  ;;  %v2560_v26 = vunpack.i.l.bf16 %v2559_v23 }
 0x17e   : > { %2044 = vmatprep.subr.bf16.mxu0 %v2043_v24  ;;  %v2554_v35 = vpop.permute.xlu0 %2553 }
 0x17f   : > { %v600_v31 = vsel %vm436_vm4, %v2560_v26, %v2540_v16  ;;  %v602_v34 = vsel %vm436_vm4, %v2561_v25, %v2545_v13  ;;  %v2556_v43 = vunpack.i.h.bf16 %v2554_v35  ;;  %v2555_v44 = vunpack.i.l.bf16 %v2554_v35 }
 0x180   : > { %v2564_v36 = vpop.permute.xlu1 %2563  ;;  %v2045_v37 = vpack.c.bf16 %v602_v34, %v600_v31  ;;  %v2686_v25 = vmov 1  }
 0x181   : > { %v2566_v39 = vunpack.i.h.bf16 %v2564_v36  ;;  %v2565_v40 = vunpack.i.l.bf16 %v2564_v36  ;;  %v611_v53 = vsel %vm436_vm4, %v2555_v44, %v2556_v43  ;;  %2598 = vset.pattern.permute.xlu0 %v2686_v25 }
 0x182   : > { %2046 = vmatpush1.bf16.msra.mxu0 %v2045_v37  ;;  %v593_v54 = vpop.permute.xlu0 %592 }
 0x183   : > { %v607_v45 = vsel %vm436_vm4, %v2565_v40, %v2566_v39  ;;  %v606_v46 = vsel %vm436_vm4, %v2551_v38, %v2565_v40 }
 0x184   : > { %v2569_v47 = vpop.permute.xlu1 %2568  ;;  %v2047_v48 = vpack.c.bf16 %v607_v45, %v605_v41  ;;  %v2049_v49 = vpack.c.bf16 %v606_v46, %v604_v42 }
 0x185   : > { %v2571_v50 = vunpack.i.h.bf16 %v2569_v47  ;;  %v2570_v51 = vunpack.i.l.bf16 %v2569_v47 }
 0x186   : > { %2048 = vmatprep.subr.bf16.mxu0 %v2047_v48  ;;  %v591_v0 = vpop.permute.xlu0 %590 }
 0x187   : > { %2050 = vmatpush1.bf16.msra.mxu0 %v2049_v49  ;;  %v609_v52 = vsel %vm436_vm4, %v2570_v51, %v2571_v50  ;;  %v612_v3 = vsel %vm436_vm4, %v591_v0, %v593_v54 }
 0x188   : > { %v2574_v55 = vpop.permute.xlu1 %2573  ;;  %v2051_v56 = vpack.c.bf16 %v611_v53, %v609_v52 }
 0x189   : > { %v2576_v57 = vunpack.i.h.bf16 %v2574_v55  ;;  %v2575_v58 = vunpack.i.l.bf16 %v2574_v55 }
 0x18a   : > { %2052 = vmatprep.subr.bf16.mxu0 %v2051_v56 }
 0x18b   : > { %v608_v59 = vsel %vm436_vm4, %v2575_v58, %v2570_v51  ;;  %v610_v60 = vsel %vm436_vm4, %v2576_v57, %v2555_v44  ;;  %v735_v51 = vld [vmem:[%s3401_s2] sm:$0xff] }
 0x18c   : > { %v595_v61 = vpop.permute.xlu1 %594  ;;  %v2053_v62 = vpack.c.bf16 %v610_v60, %v608_v59 }
 0x18d   : > { %v613_v63 = vsel %vm436_vm4, %v593_v54, %v595_v61 }
 0x18e   : > { %2054 = vmatpush1.bf16.msra.mxu0 %v2053_v62 }
 0x18f   : > { %652 = vmatprep.subr.mxu0 %v613_v63 }
 0x192   : > { %653 = vmatpush1.msra.mxu0 %v612_v3 }
 0x193   : > { %2030 = vmatmul.mubr.msk.f32.vlgmr.msra.gmra.mrb[0].mxu0 %vm632_vm12, %v532_v2 }
 0x194   : > { %1278 = vmatprep.mubr.f32.mxu0 %v2671_v1 }
 0x19d   : > { %v537_v4 = vpop.permute.xlu1 %536 }
 0x266   : > { %v702_v5 = vpop.f32.mrb[0].mxu0 }
 0x267   : > { %v703_v6 = vadd.f32 %v702_v5, %v537_v4  ;;  %v704_v7 = vpop.f32.mrb[1].mxu0 }
 0x268   : > { %v705_v8 = vadd.f32 %v704_v7, %v537_v4 }
 0x269   : > { %v2878_v10 = vmax.f32 %v703_v6, 0.0 }
 0x26a   : > { %v2880_v11 = vmax.f32 %v705_v8, 0.0 }
 0x26b   : > { %727 = vrot.lane.b32.xlu1 %v2878_v10, %s2682_s29 }
 0x26c   : > { %v2578_v12 = vpack.i.bf16 %v2880_v11, %v2878_v10 }
 0x26e   : > { %2579 = vrot.lane.b32.xlu0 %v2578_v12, %s2678_s25 }
 0x26f   : > { %731 = vrot.lane.b32.xlu1 %v2671_v1, %s2682_s29 }
 0x272   : > { %729 = vrot.lane.b32.xlu0 %v2880_v11, %s2682_s29 }
 0x276   : > { %2584 = vrot.lane.b32.xlu0 %v2578_v12, %s2685_s16  ;;  %v2687_v12 = vmov 2  }
 0x2dd   : > { %v728_v14 = vpop.permute.xlu1 %727 }
 0x2e0   : > { %v2580_v13 = vpop.permute.xlu0 %2579 }
 0x2e1   : > { %v2582_v15 = vunpack.i.h.bf16 %v2580_v13  ;;  %v2581_v16 = vunpack.i.l.bf16 %v2580_v13  ;;  %v732_v23 = vpop.permute.xlu1 %731 }
 0x2e3   : > { %v723_v17 = vsel %vm476_vm6, %v2581_v16, %v2582_v15  ;;  %v2588_v18 = vpack.i.bf16 %v2581_v16, %v2671_v1 }
 0x2e4   : > { %v2593_v20 = vpack.i.bf16 %v2582_v15, %v723_v17  ;;  %v730_v24 = vpop.permute.xlu0 %729 }
 0x2e5   : > { %2589 = vrot.lane.b32.xlu0 %v2588_v18, %s2685_s16  ;;  %v734_v26 = vsel %vm505_vm10, %v730_v24, %v732_v23  ;;  %v733_v28 = vsel %vm505_vm10, %v728_v14, %v730_v24 }
 0x2e6   : > { %2594 = vrot.lane.b32.xlu1 %v2593_v20, %s2685_s16 }
 0x2e8   : > { %v2585_v29 = vpop.permute.xlu0 %2584 }
 0x2e9   : > { %759 = vrot.lane.b32.xlu0 %v734_v26, %s2685_s16  ;;  %v2587_v30 = vunpack.i.h.bf16 %v2585_v29  ;;  %v2586_v31 = vunpack.i.l.bf16 %v2585_v29 }
 0x2ea   : > { %757 = vrot.lane.b32.xlu1 %v733_v28, %s2685_s16 }
 0x2eb   : > { %v763_v41 = vsel %vm761_vm13, %v2586_v31, %v2587_v30 }
 0x2ed   : > { %739 = vperm.xlu0 %2598, %v2857_v9  }
 0x2ee   : > { %755 = vrot.lane.b32.xlu1 %v728_v14, %s2685_s16 }
 0x2f1   : > { %2619 = vset.pattern.permute.xlu0 %v2687_v12 }
 0x357   : > { %v2590_v34 = vpop.permute.xlu0 %2589 }
 0x358   : > { %v2592_v35 = vunpack.i.h.bf16 %v2590_v34  ;;  %v2591_v36 = vunpack.i.l.bf16 %v2590_v34  ;;  %v2595_v37 = vpop.permute.xlu1 %2594 }
 0x359   : > { %v2597_v38 = vunpack.i.h.bf16 %v2595_v37  ;;  %v2596_v39 = vunpack.i.l.bf16 %v2595_v37 }
 0x35a   : > { %v762_v40 = vsel %vm761_vm13, %v2591_v36, %v2586_v31 }
 0x35b   : > { %v765_v42 = vsel %vm761_vm13, %v2596_v39, %v2597_v38  ;;  %v764_v43 = vsel %vm761_vm13, %v2592_v35, %v2596_v39  ;;  %v760_v44 = vpop.permute.xlu0 %759 }
 0x35c   : > { %v758_v45 = vpop.permute.xlu1 %757  ;;  %v2055_v46 = vpack.c.bf16 %v765_v42, %v763_v41  ;;  %v2057_v47 = vpack.c.bf16 %v764_v43, %v762_v40  ;;  %v883_v43 = vld [vmem:[%s3402_s3] sm:$0xff] }
 0x35d   : > { %v767_v48 = vsel %vm761_vm13, %v758_v45, %v760_v44 }
 0x35e   : > { %2056 = vmatprep.subr.bf16.mxu1 %v2055_v46 }
 0x35f   : > { %2058 = vmatpush1.bf16.msra.mxu1 %v2057_v47 }
 0x360   : > { %v756_v49 = vpop.permute.xlu1 %755  ;;  %782 = vmatprep.subr.mxu1 %v767_v48 }
 0x361   : > { %v766_v50 = vsel %vm761_vm13, %v756_v49, %v758_v45 }
 0x363   : > { %783 = vmatpush1.msra.mxu1 %v766_v50 }
 0x364   : > { %2031 = vmatmul.mubr.msk.f32.vlgmr.msra.gmra.mrb[0].mxu1 %vm774_vm14, %v735_v51 }
 0x365   : > { %990 = vmatprep.mubr.f32.mxu1 %v2671_v1 }
 0x36c   : > { %v740_v52 = vpop.permute.xlu0 %739 }
 0x437   : > { %v844_v53 = vpop.f32.mrb[0].mxu1 }
 0x438   : > { %v845_v54 = vadd.f32 %v844_v53, %v740_v52  ;;  %v846_v55 = vpop.f32.mrb[1].mxu1 }
 0x439   : > { %v847_v56 = vadd.f32 %v846_v55, %v740_v52 }
 0x43a   : > { %v849_v57 = vmax.f32 %v845_v54, 0.0 }
 0x43b   : > { %v850_v58 = vmax.f32 %v847_v56, 0.0 }
 0x43c   : > { %v857_v59 = vmul.f32 %v849_v57, %v2788_v22  ;;  %v862_v0 = vmul.f32 %v849_v57, %v2796_v27 }
 0x43d   : > { %v858_v60 = vmul.f32 %v850_v58, %v2784_v21  ;;  %v863_v61 = vmul.f32 %v850_v58, %v2803_v32  ;;  %v2599_v62 = vpack.i.bf16 %v850_v58, %v849_v57 }
 0x43f   : > { %877 = vrot.lane.b32.xlu0 %v863_v61, %s2679_s26  ;;  %2600 = vrot.lane.b32.xlu1 %v2599_v62, %s2673_s17  ;;  %v2604_v63 = vpack.i.bf16 %v858_v60, %v857_v59  ;;  %v2688_v59 = vmov 3  }
 0x443   : > { %875 = vrot.lane.b32.xlu1 %v862_v0, %s2679_s26  ;;  %2605 = vrot.lane.b32.xlu0 %v2604_v63, %s2674_s21 }
 0x447   : > { %879 = vrot.lane.b32.xlu1 %v2805_v33, %s2679_s26 }
 0x4b1   : > { %v2601_v2 = vpop.permute.xlu1 %2600  ;;  %v878_v13 = vpop.permute.xlu0 %877 }
 0x4b2   : > { %v2603_v3 = vunpack.i.h.bf16 %v2601_v2  ;;  %v2602_v4 = vunpack.i.l.bf16 %v2601_v2 }
 0x4b4   : > { %v871_v5 = vsel %vm397_vm0, %v2602_v4, %v2603_v3  ;;  %v2609_v6 = vpack.i.bf16 %v2602_v4, %v2779_v19 }
 0x4b5   : > { %v2614_v7 = vpack.i.bf16 %v2603_v3, %v871_v5  ;;  %v876_v8 = vpop.permute.xlu1 %875  ;;  %v2606_v17 = vpop.permute.xlu0 %2605 }
 0x4b6   : > { %2610 = vrot.lane.b32.xlu0 %v2609_v6, %s2674_s21  ;;  %v881_v15 = vsel %vm464_vm7, %v876_v8, %v878_v13  ;;  %v2608_v18 = vunpack.i.h.bf16 %v2606_v17  ;;  %v2607_v20 = vunpack.i.l.bf16 %v2606_v17 }
 0x4b7   : > { %2615 = vrot.lane.b32.xlu1 %v2614_v7, %s2674_s21 }
 0x4b8   : > { %v912_v34 = vsel %vm412_vm2, %v2607_v20, %v2608_v18 }
 0x4b9   : > { %v880_v14 = vpop.permute.xlu1 %879 }
 0x4ba   : > { %v882_v16 = vsel %vm464_vm7, %v878_v13, %v880_v14 }
 0x4bb   : > { %907 = vrot.lane.b32.xlu1 %v881_v15, %s2674_s21  ;;  %909 = vrot.lane.b32.xlu0 %v882_v16, %s2674_s21 }
 0x4bf   : > { %905 = vrot.lane.b32.xlu1 %v876_v8, %s2674_s21  ;;  %887 = vperm.xlu0 %2619, %v2857_v9  }
 0x4c3   : > { %2640 = vset.pattern.permute.xlu0 %v2688_v59 }
 0x528   : > { %v2611_v23 = vpop.permute.xlu0 %2610 }
 0x529   : > { %v2613_v24 = vunpack.i.h.bf16 %v2611_v23  ;;  %v2612_v25 = vunpack.i.l.bf16 %v2611_v23  ;;  %v2616_v26 = vpop.permute.xlu1 %2615 }
 0x52a   : > { %v2618_v28 = vunpack.i.h.bf16 %v2616_v26  ;;  %v2617_v29 = vunpack.i.l.bf16 %v2616_v26  ;;  %v1025_v26 = vld [vmem:[%s3403_s4] sm:$0xff] }
 0x52b   : > { %v911_v30 = vsel %vm412_vm2, %v2612_v25, %v2607_v20 }
 0x52c   : > { %v913_v31 = vsel %vm412_vm2, %v2613_v24, %v2617_v29  ;;  %v914_v35 = vsel %vm412_vm2, %v2617_v29, %v2618_v28 }
 0x52d   : > { %v2061_v36 = vpack.c.bf16 %v913_v31, %v911_v30  ;;  %v908_v37 = vpop.permute.xlu1 %907  ;;  %v910_v38 = vpop.permute.xlu0 %909  ;;  %v2059_v39 = vpack.c.bf16 %v914_v35, %v912_v34 }
 0x52e   : > { %v916_v40 = vsel %vm412_vm2, %v908_v37, %v910_v38 }
 0x52f   : > { %2060 = vmatprep.subr.bf16.mxu1 %v2059_v39 }
 0x530   : > { %2062 = vmatpush1.bf16.msra.mxu1 %v2061_v36 }
 0x531   : > { %v906_v41 = vpop.permute.xlu1 %905  ;;  %930 = vmatprep.subr.mxu1 %v916_v40 }
 0x532   : > { %v915_v42 = vsel %vm412_vm2, %v906_v41, %v908_v37 }
 0x534   : > { %931 = vmatpush1.msra.mxu1 %v915_v42 }
 0x535   : > { %2032 = vmatmul.mubr.msk.f32.vlgmr.msra.gmra.mrb[2].mxu1 %vm774_vm14, %v883_v43 }
 0x536   : > { %1130 = vmatprep.mubr.f32.mxu1 %v2671_v1 }
 0x53e   : > { %v888_v44 = vpop.permute.xlu0 %887 }
 0x608   : > { %v992_v45 = vpop.f32.mrb[2].mxu1 }
 0x609   : > { %v993_v46 = vadd.f32 %v992_v45, %v888_v44  ;;  %v994_v47 = vpop.f32.mrb[3].mxu1 }
 0x60a   : > { %v995_v48 = vadd.f32 %v994_v47, %v888_v44  ;;  %v1293_v47 = vld [vmem:[%s3407_s8 + $0x20] sm:$0xff] }
 0x60b   : > { %v997_v49 = vmax.f32 %v993_v46, 0.0 }
 0x60c   : > { %v998_v50 = vmax.f32 %v995_v48, 0.0  ;;  %v1297_v48 = vld [vmem:[%s3407_s8 + $0x40] sm:$0xff] }
 0x60e   : > { %1019 = vrot.lane.b32.xlu0 %v998_v50, %s2682_s29  ;;  %v2620_v51 = vpack.i.bf16 %v998_v50, %v997_v49 }
 0x610   : > { %2621 = vrot.lane.b32.xlu1 %v2620_v51, %s2678_s25 }
 0x612   : > { %2626 = vrot.lane.b32.xlu0 %v2620_v51, %s2685_s16 }
 0x614   : > { %1017 = vrot.lane.b32.xlu1 %v997_v49, %s2682_s29  ;;  %v2689_v49 = vmov 4  }
 0x618   : > { %1021 = vrot.lane.b32.xlu1 %v2671_v1, %s2682_s29 }
 0x680   : > { %v1020_v60 = vpop.permute.xlu0 %1019 }
 0x682   : > { %v2622_v52 = vpop.permute.xlu1 %2621 }
 0x683   : > { %v2624_v53 = vunpack.i.h.bf16 %v2622_v52  ;;  %v2623_v54 = vunpack.i.l.bf16 %v2622_v52 }
 0x685   : > { %v1013_v55 = vsel %vm476_vm6, %v2623_v54, %v2624_v53  ;;  %v2630_v56 = vpack.i.bf16 %v2623_v54, %v2671_v1  ;;  %v2627_v1 = vpop.permute.xlu0 %2626 }
 0x686   : > { %v2635_v57 = vpack.i.bf16 %v2624_v53, %v1013_v55  ;;  %v1018_v58 = vpop.permute.xlu1 %1017  ;;  %v2629_v0 = vunpack.i.h.bf16 %v2627_v1  ;;  %v2628_v2 = vunpack.i.l.bf16 %v2627_v1 }
 0x687   : > { %2631 = vrot.lane.b32.xlu0 %v2630_v56, %s2685_s16  ;;  %v1023_v62 = vsel %vm505_vm10, %v1018_v58, %v1020_v60 }
 0x688   : > { %2636 = vrot.lane.b32.xlu1 %v2635_v57, %s2685_s16  ;;  %v1052_v14 = vsel %vm761_vm13, %v2628_v2, %v2629_v0  ;;  %v1305_v57 = vld [vmem:[%s3407_s8 + $0x80] sm:$0xff] }
 0x689   : > { %v1321_v0 = vld [vmem:[%s3407_s8 + $0x100] sm:$0xff] }
 0x68a   : > { %v1022_v61 = vpop.permute.xlu1 %1021 }
 0x68b   : > { %v1024_v63 = vsel %vm505_vm10, %v1020_v60, %v1022_v61  ;;  %v1313_v61 = vld [vmem:[%s3407_s8 + $0xc0] sm:$0xff] }
 0x68c   : > { %1047 = vrot.lane.b32.xlu1 %v1023_v62, %s2685_s16  ;;  %1049 = vrot.lane.b32.xlu0 %v1024_v63, %s2685_s16  ;;  %v1317_v62 = vld [vmem:[%s3407_s8 + $0xe0] sm:$0xff] }
 0x68d   : > { %v2333_v63 = vcombine.high %v1313_v61, %v1317_v62  ;;  %v2334_v1 = vcombine.low %v1313_v61, %v1317_v62 }
 0x690   : > { %1045 = vrot.lane.b32.xlu1 %v1018_v58, %s2685_s16  ;;  %1029 = vperm.xlu0 %2640, %v2857_v9   ;;  %v1309_v58 = vld [vmem:[%s3407_s8 + $0xa0] sm:$0xff]  ;;  %s2038_s16 = sshll.u32 %s3410_s10, 6 }
 0x691   : > { %v2331_v59 = vcombine.high %v1305_v57, %v1309_v58  ;;  %v2332_v60 = vcombine.low %v1305_v57, %v1309_v58  ;;  %s332_s20 = scalar_lea.vmem %s3408_s9, %s2038_s16 }
 0x694   : > { %2661 = vset.pattern.permute.xlu0 %v2689_v49 }
 0x6f9   : > { %v2632_v3 = vpop.permute.xlu0 %2631 }
 0x6fa   : > { %v2634_v4 = vunpack.i.h.bf16 %v2632_v3  ;;  %v2633_v5 = vunpack.i.l.bf16 %v2632_v3  ;;  %v2637_v6 = vpop.permute.xlu1 %2636 }
 0x6fb   : > { %v2639_v7 = vunpack.i.h.bf16 %v2637_v6  ;;  %v2638_v8 = vunpack.i.l.bf16 %v2637_v6 }
 0x6fc   : > { %v1051_v12 = vsel %vm761_vm13, %v2633_v5, %v2628_v2  ;;  %v1325_v2 = vld [vmem:[%s3407_s8 + $0x120] sm:$0xff] }
 0x6fd   : > { %v1053_v13 = vsel %vm761_vm13, %v2634_v4, %v2638_v8  ;;  %v1054_v15 = vsel %vm761_vm13, %v2638_v8, %v2639_v7  ;;  %v2335_v3 = vcombine.high %v1321_v0, %v1325_v2  ;;  %v2336_v4 = vcombine.low %v1321_v0, %v1325_v2  ;;  %v1333_v5 = vld [vmem:[%s3407_s8 + $0x160] sm:$0xff]  ;;  %v1294_v0 = vld [vmem:[%s3407_s8 + $0x28] sm:$0xff] }
 0x6fe   : > { %v2065_v16 = vpack.c.bf16 %v1053_v13, %v1051_v12  ;;  %v1048_v17 = vpop.permute.xlu1 %1047  ;;  %v1050_v18 = vpop.permute.xlu0 %1049  ;;  %v2063_v20 = vpack.c.bf16 %v1054_v15, %v1052_v14  ;;  %v1337_v8 = vld [vmem:[%s3407_s8 + $0x180] sm:$0xff] }
 0x6ff   : > { %v1056_v23 = vsel %vm761_vm13, %v1048_v17, %v1050_v18  ;;  %v1341_v12 = vld [vmem:[%s3407_s8 + $0x1a0] sm:$0xff] }
 0x700   : > { %2064 = vmatprep.subr.bf16.mxu1 %v2063_v20  ;;  %v2339_v13 = vcombine.high %v1337_v8, %v1341_v12  ;;  %v2340_v14 = vcombine.low %v1337_v8, %v1341_v12  ;;  %v1345_v15 = vld [vmem:[%s3407_s8 + $0x1c0] sm:$0xff] }
 0x701   : > { %2066 = vmatpush1.bf16.msra.mxu1 %v2065_v16  ;;  %v1349_v16 = vld [vmem:[%s3407_s8 + $0x1e0] sm:$0xff] }
 0x702   : > { %v1046_v24 = vpop.permute.xlu1 %1045  ;;  %1070 = vmatprep.subr.mxu1 %v1056_v23  ;;  %v2342_v18 = vcombine.low %v1345_v15, %v1349_v16  ;;  %v1353_v20 = vld [vmem:[%s3407_s8 + $0x200] sm:$0xff] }
 0x703   : > { %v1055_v25 = vsel %vm761_vm13, %v1046_v24, %v1048_v17  ;;  %v2341_v17 = vcombine.high %v1345_v15, %v1349_v16  ;;  %v1357_v23 = vld [vmem:[%s3407_s8 + $0x220] sm:$0xff] }
 0x704   : > { %v2343_v24 = vcombine.high %v1353_v20, %v1357_v23 }
 0x705   : > { %1071 = vmatpush1.msra.mxu1 %v1055_v25  ;;  %v2344_v25 = vcombine.low %v1353_v20, %v1357_v23 }
 0x706   : > { %2033 = vmatmul.mubr.msk.f32.vlgmr.msra.gmra.mrb[4].mxu1 %vm774_vm14, %v1025_v26  ;;  %v1361_v26 = vld [vmem:[%s3407_s8 + $0x240] sm:$0xff] }
 0x70f   : > { %v1030_v28 = vpop.permute.xlu0 %1029 }
 0x7d9   : > { %v1132_v29 = vpop.f32.mrb[4].mxu1 }
 0x7da   : > { %v1133_v30 = vadd.f32 %v1132_v29, %v1030_v28  ;;  %v1134_v31 = vpop.f32.mrb[5].mxu1 }
 0x7db   : > { %v1135_v34 = vadd.f32 %v1134_v31, %v1030_v28  ;;  %v1365_v28 = vld [vmem:[%s3407_s8 + $0x260] sm:$0xff] }
 0x7dc   : > { %v1137_v35 = vmax.f32 %v1133_v30, 0.0  ;;  %v2345_v29 = vcombine.high %v1361_v26, %v1365_v28  ;;  %v2346_v30 = vcombine.low %v1361_v26, %v1365_v28  ;;  %v1369_v31 = vld [vmem:[%s3407_s8 + $0x280] sm:$0xff] }
 0x7dd   : > { %v1138_v36 = vmax.f32 %v1135_v34, 0.0  ;;  %v1373_v34 = vld [vmem:[%s3407_s8 + $0x2a0] sm:$0xff] }
 0x7de   : > { %v1145_v37 = vmul.f32 %v1137_v35, %v2788_v22  ;;  %v1150_v42 = vmul.f32 %v1137_v35, %v2796_v27  ;;  %v1289_v27 = vld [vmem:[%s3407_s8] sm:$0xff] }
 0x7df   : > { %v1146_v38 = vmul.f32 %v1138_v36, %v2784_v21  ;;  %v1151_v39 = vmul.f32 %v1138_v36, %v2803_v32  ;;  %v2641_v40 = vpack.i.bf16 %v1138_v36, %v1137_v35  ;;  %v2328_v50 = vcombine.low %v1289_v27, %v1293_v47 }
 0x7e0   : > { %v2347_v35 = vcombine.high %v1369_v31, %v1373_v34  ;;  %v2348_v36 = vcombine.low %v1369_v31, %v1373_v34 }
 0x7e1   : > { %1165 = vrot.lane.b32.xlu0 %v1151_v39, %s2679_s26  ;;  %2642 = vrot.lane.b32.xlu1 %v2641_v40, %s2673_s17  ;;  %v2646_v41 = vpack.i.bf16 %v1146_v38, %v1145_v37  ;;  %v1377_v37 = vld [vmem:[%s3407_s8 + $0x2c0] sm:$0xff] }
 0x7e2   : > { %v1381_v38 = vld [vmem:[%s3407_s8 + $0x2e0] sm:$0xff] }
 0x7e3   : > { %v2349_v39 = vcombine.high %v1377_v37, %v1381_v38  ;;  %v2350_v40 = vcombine.low %v1377_v37, %v1381_v38 }
 0x7e5   : > { %1163 = vrot.lane.b32.xlu1 %v1150_v42, %s2679_s26  ;;  %2647 = vrot.lane.b32.xlu0 %v2646_v41, %s2674_s21  ;;  %v1385_v41 = vld [vmem:[%s3407_s8 + $0x300] sm:$0xff] }
 0x7e6   : > { %v1389_v42 = vld [vmem:[%s3407_s8 + $0x320] sm:$0xff] }
 0x7e9   : > { %1167 = vrot.lane.b32.xlu1 %v2805_v33, %s2679_s26  ;;  %v2327_v33 = vcombine.high %v1289_v27, %v1293_v47  ;;  %v1405_v27 = vld [vmem:[%s3407_s8 + $0x3a0] sm:$0xff] }
 0x7eb   : > { %2072 = vmatprep.subr.bf16.mxu1 %v2327_v33 }
 0x7ec   : > { %2074 = vmatpush1.bf16.msra.mxu1 %v2328_v50 }
 0x853   : > { %v2643_v22 = vpop.permute.xlu1 %2642  ;;  %v1166_v52 = vpop.permute.xlu0 %1165 }
 0x854   : > { %v2645_v43 = vunpack.i.h.bf16 %v2643_v22  ;;  %v2644_v21 = vunpack.i.l.bf16 %v2643_v22  ;;  %v2351_v22 = vcombine.high %v1385_v41, %v1389_v42 }
 0x856   : > { %v1159_v32 = vsel %vm397_vm0, %v2644_v21, %v2645_v43  ;;  %v2651_v44 = vpack.i.bf16 %v2644_v21, %v2779_v19  ;;  %v1301_v19 = vld [vmem:[%s3407_s8 + $0x60] sm:$0xff] }
 0x857   : > { %v2656_v45 = vpack.i.bf16 %v2645_v43, %v1159_v32  ;;  %v1164_v46 = vpop.permute.xlu1 %1163  ;;  %v2329_v51 = vcombine.high %v1297_v48, %v1301_v19  ;;  %v2330_v54 = vcombine.low %v1297_v48, %v1301_v19  ;;  %v2352_v43 = vcombine.low %v1385_v41, %v1389_v42  ;;  %v1393_v21 = vld [vmem:[%s3407_s8 + $0x340] sm:$0xff]  ;;  %v2648_v48 = vpop.permute.xlu0 %2647 }
 0x858   : > { %2652 = vrot.lane.b32.xlu0 %v2651_v44, %s2674_s21  ;;  %v1169_v55 = vsel %vm464_vm7, %v1164_v46, %v1166_v52  ;;  %v1397_v32 = vld [vmem:[%s3407_s8 + $0x360] sm:$0xff]  ;;  %v2650_v19 = vunpack.i.h.bf16 %v2648_v48  ;;  %v2649_v49 = vunpack.i.l.bf16 %v2648_v48 }
 0x859   : > { %2657 = vrot.lane.b32.xlu1 %v2656_v45, %s2674_s21  ;;  %2076 = vmatprep.subr.bf16.mxu1 %v2329_v51  ;;  %v2353_v44 = vcombine.high %v1393_v21, %v1397_v32  ;;  %v2354_v45 = vcombine.low %v1393_v21, %v1397_v32 }
 0x85a   : > { %2078 = vmatpush1.bf16.msra.mxu1 %v2330_v54  ;;  %v1200_v58 = vsel %vm412_vm2, %v2649_v49, %v2650_v19 }
 0x85b   : > { %v1168_v53 = vpop.permute.xlu1 %1167  ;;  %2080 = vmatprep.subr.bf16.mxu1 %v2331_v59 }
 0x85c   : > { %v1170_v56 = vsel %vm464_vm7, %v1166_v52, %v1168_v53 }
 0x85d   : > { %1195 = vrot.lane.b32.xlu1 %v1169_v55, %s2674_s21  ;;  %1197 = vrot.lane.b32.xlu0 %v1170_v56, %s2674_s21 }
 0x85e   : > { %2082 = vmatpush1.bf16.msra.mxu1 %v2332_v60 }
 0x85f   : > { %2084 = vmatprep.subr.bf16.mxu1 %v2333_v63 }
 0x861   : > { %1193 = vrot.lane.b32.xlu1 %v1164_v46, %s2674_s21  ;;  %1175 = vperm.xlu0 %2661, %v2857_v9   ;;  %v1329_v9 = vld [vmem:[%s3407_s8 + $0x140] sm:$0xff] }
 0x862   : > { %2086 = vmatpush1.bf16.msra.mxu1 %v2334_v1  ;;  %v2337_v6 = vcombine.high %v1329_v9, %v1333_v5  ;;  %v2338_v7 = vcombine.low %v1329_v9, %v1333_v5  ;;  %v1401_v46 = vld [vmem:[%s3407_s8 + $0x380] sm:$0xff]  ;;  %v1290_v1 = vld [vmem:[%s3407_s8 + $0x8] sm:$0xff] }
 0x863   : > { %2088 = vmatprep.subr.bf16.mxu1 %v2335_v3  ;;  %v2355_v47 = vcombine.high %v1401_v46, %v1405_v27  ;;  %v2356_v33 = vcombine.low %v1401_v46, %v1405_v27  ;;  %v1298_v3 = vld [vmem:[%s3407_s8 + $0x48] sm:$0xff]  ;;  %v2359_v5 = vcombine.high %v1290_v1, %v1294_v0  ;;  %v2360_v8 = vcombine.low %v1290_v1, %v1294_v0 }
 0x866   : > { %2090 = vmatpush1.bf16.msra.mxu1 %v2336_v4  ;;  %v1302_v4 = vld [vmem:[%s3407_s8 + $0x68] sm:$0xff] }
 0x867   : > { %2092 = vmatprep.subr.bf16.mxu1 %v2337_v6  ;;  %v2361_v12 = vcombine.high %v1298_v3, %v1302_v4  ;;  %v2362_v15 = vcombine.low %v1298_v3, %v1302_v4  ;;  %v1413_v3 = vld [vmem:[%s3407_s8 + $0x3e0] sm:$0xff]  ;;  %v1410_v4 = vld [vmem:[%s3407_s8 + $0x3c8] sm:$0xff] }
 0x86a   : > { %2094 = vmatpush1.bf16.msra.mxu1 %v2338_v7  ;;  %v1171_v7 = vld [vmem:[%s3404_s5] sm:$0xff] }
 0x86b   : > { %2096 = vmatprep.subr.bf16.mxu1 %v2339_v13  ;;  %v1306_v13 = vld [vmem:[%s3407_s8 + $0x88] sm:$0xff] }
 0x86e   : > { %2098 = vmatpush1.bf16.msra.mxu1 %v2340_v14  ;;  %v1310_v14 = vld [vmem:[%s3407_s8 + $0xa8] sm:$0xff] }
 0x86f   : > { %2100 = vmatprep.subr.bf16.mxu1 %v2341_v17  ;;  %v2363_v16 = vcombine.high %v1306_v13, %v1310_v14  ;;  %v1314_v17 = vld [vmem:[%s3407_s8 + $0xc8] sm:$0xff]  ;;  %v2364_v20 = vcombine.low %v1306_v13, %v1310_v14  ;;  %v1295_v13 = vld [vmem:[%s3407_s8 + $0x30] sm:$0xff]  ;;  %v1292_v14 = vld [vmem:[%s3407_s8 + $0x18] sm:$0xff] }
 0x872   : > { %2102 = vmatpush1.bf16.msra.mxu1 %v2342_v18  ;;  %v1318_v18 = vld [vmem:[%s3407_s8 + $0xe8] sm:$0xff] }
 0x873   : > { %2104 = vmatprep.subr.bf16.mxu1 %v2343_v24  ;;  %v2365_v23 = vcombine.high %v1314_v17, %v1318_v18  ;;  %v1322_v24 = vld [vmem:[%s3407_s8 + $0x108] sm:$0xff]  ;;  %v2366_v26 = vcombine.low %v1314_v17, %v1318_v18 }
 0x876   : > { %2106 = vmatpush1.bf16.msra.mxu1 %v2344_v25  ;;  %v1326_v25 = vld [vmem:[%s3407_s8 + $0x128] sm:$0xff] }
 0x877   : > { %2108 = vmatprep.subr.bf16.mxu1 %v2345_v29  ;;  %v2367_v28 = vcombine.high %v1322_v24, %v1326_v25  ;;  %v1330_v29 = vld [vmem:[%s3407_s8 + $0x148] sm:$0xff]  ;;  %v2368_v31 = vcombine.low %v1322_v24, %v1326_v25 }
 0x87a   : > { %2110 = vmatpush1.bf16.msra.mxu1 %v2346_v30  ;;  %v1334_v30 = vld [vmem:[%s3407_s8 + $0x168] sm:$0xff] }
 0x87b   : > { %2112 = vmatprep.subr.bf16.mxu1 %v2347_v35  ;;  %v2369_v34 = vcombine.high %v1330_v29, %v1334_v30  ;;  %v1338_v35 = vld [vmem:[%s3407_s8 + $0x188] sm:$0xff]  ;;  %v2370_v37 = vcombine.low %v1330_v29, %v1334_v30 }
 0x87e   : > { %2114 = vmatpush1.bf16.msra.mxu1 %v2348_v36  ;;  %v1342_v36 = vld [vmem:[%s3407_s8 + $0x1a8] sm:$0xff] }
 0x87f   : > { %2116 = vmatprep.subr.bf16.mxu1 %v2349_v39  ;;  %v2371_v38 = vcombine.high %v1338_v35, %v1342_v36  ;;  %v1346_v39 = vld [vmem:[%s3407_s8 + $0x1c8] sm:$0xff]  ;;  %v2372_v41 = vcombine.low %v1338_v35, %v1342_v36  ;;  %v1300_v35 = vld [vmem:[%s3407_s8 + $0x58] sm:$0xff] }
 0x880   : > { %v1304_v36 = vld [vmem:[%s3407_s8 + $0x78] sm:$0xff] }
 0x882   : > { %2118 = vmatpush1.bf16.msra.mxu1 %v2350_v40  ;;  %v1350_v40 = vld [vmem:[%s3407_s8 + $0x1e8] sm:$0xff] }
 0x883   : > { %2120 = vmatprep.subr.bf16.mxu1 %v2351_v22  ;;  %v2373_v42 = vcombine.high %v1346_v39, %v1350_v40  ;;  %v1354_v22 = vld [vmem:[%s3407_s8 + $0x208] sm:$0xff]  ;;  %v2374_v21 = vcombine.low %v1346_v39, %v1350_v40  ;;  %v2425_v39 = vcombine.high %v1300_v35, %v1304_v36  ;;  %v1311_v40 = vld [vmem:[%s3407_s8 + $0xb0] sm:$0xff] }
 0x886   : > { %2122 = vmatpush1.bf16.msra.mxu1 %v2352_v43  ;;  %v1358_v43 = vld [vmem:[%s3407_s8 + $0x228] sm:$0xff] }
 0x887   : > { %2124 = vmatprep.subr.bf16.mxu1 %v2353_v44  ;;  %v2375_v32 = vcombine.high %v1354_v22, %v1358_v43  ;;  %v1362_v44 = vld [vmem:[%s3407_s8 + $0x248] sm:$0xff]  ;;  %v2376_v46 = vcombine.low %v1354_v22, %v1358_v43  ;;  %v2426_v43 = vcombine.low %v1300_v35, %v1304_v36  ;;  %v1364_v35 = vld [vmem:[%s3407_s8 + $0x258] sm:$0xff] }
 0x888   : > { %v1368_v36 = vld [vmem:[%s3407_s8 + $0x278] sm:$0xff] }
 0x88a   : > { %2126 = vmatpush1.bf16.msra.mxu1 %v2354_v45  ;;  %v1366_v45 = vld [vmem:[%s3407_s8 + $0x268] sm:$0xff] }
 0x88b   : > { %2128 = vmatprep.subr.bf16.mxu1 %v2355_v47  ;;  %v2377_v27 = vcombine.high %v1362_v44, %v1366_v45  ;;  %v1370_v47 = vld [vmem:[%s3407_s8 + $0x288] sm:$0xff]  ;;  %v2378_v48 = vcombine.low %v1362_v44, %v1366_v45  ;;  %v1315_v44 = vld [vmem:[%s3407_s8 + $0xd0] sm:$0xff] }
 0x88c   : > { %v1319_v45 = vld [vmem:[%s3407_s8 + $0xf0] sm:$0xff] }
 0x88e   : > { %2130 = vmatpush1.bf16.msra.mxu1 %v2356_v33  ;;  %v1374_v33 = vld [vmem:[%s3407_s8 + $0x2a8] sm:$0xff] }
 0x88f   : > { %v2379_v19 = vcombine.high %v1370_v47, %v1374_v33 }
 0x8ca   : > { %v2653_v50 = vpop.permute.xlu0 %2652 }
 0x8cb   : > { %v2655_v51 = vunpack.i.h.bf16 %v2653_v50  ;;  %v2654_v52 = vunpack.i.l.bf16 %v2653_v50  ;;  %v2658_v53 = vpop.permute.xlu1 %2657  ;;  %v1382_v50 = vld [vmem:[%s3407_s8 + $0x2e8] sm:$0xff] }
 0x8cc   : > { %v2660_v54 = vunpack.i.h.bf16 %v2658_v53  ;;  %v2659_v55 = vunpack.i.l.bf16 %v2658_v53  ;;  %v1386_v53 = vld [vmem:[%s3407_s8 + $0x308] sm:$0xff] }
 0x8cd   : > { %v1199_v56 = vsel %vm412_vm2, %v2654_v52, %v2649_v49  ;;  %v1378_v49 = vld [vmem:[%s3407_s8 + $0x2c8] sm:$0xff] }
 0x8ce   : > { %v1201_v57 = vsel %vm412_vm2, %v2655_v51, %v2659_v55  ;;  %v1202_v59 = vsel %vm412_vm2, %v2659_v55, %v2660_v54  ;;  %v2380_v51 = vcombine.low %v1370_v47, %v1374_v33  ;;  %v2381_v52 = vcombine.high %v1378_v49, %v1382_v50  ;;  %v1390_v54 = vld [vmem:[%s3407_s8 + $0x328] sm:$0xff] }
 0x8cf   : > { %v2069_v60 = vpack.c.bf16 %v1201_v57, %v1199_v56  ;;  %v1196_v61 = vpop.permute.xlu1 %1195  ;;  %v1198_v62 = vpop.permute.xlu0 %1197  ;;  %v2067_v63 = vpack.c.bf16 %v1202_v59, %v1200_v58  ;;  %v2382_v55 = vcombine.low %v1378_v49, %v1382_v50  ;;  %v2383_v56 = vcombine.high %v1386_v53, %v1390_v54  ;;  %v1394_v57 = vld [vmem:[%s3407_s8 + $0x348] sm:$0xff]  ;;  %v1323_v49 = vld [vmem:[%s3407_s8 + $0x110] sm:$0xff] }
 0x8d0   : > { %v1204_v2 = vsel %vm412_vm2, %v1196_v61, %v1198_v62  ;;  %v1398_v58 = vld [vmem:[%s3407_s8 + $0x368] sm:$0xff]  ;;  %v2384_v59 = vcombine.low %v1386_v53, %v1390_v54  ;;  %v1327_v50 = vld [vmem:[%s3407_s8 + $0x130] sm:$0xff]  ;;  %v2398_v53 = vcombine.low %v1315_v44, %v1319_v45 }
 0x8d1   : > { %2068 = vmatprep.subr.bf16.mxu0 %v2067_v63  ;;  %v1402_v62 = vld [vmem:[%s3407_s8 + $0x388] sm:$0xff] }
 0x8d2   : > { %2070 = vmatpush1.bf16.msra.mxu0 %v2069_v60  ;;  %v2385_v60 = vcombine.high %v1394_v57, %v1398_v58  ;;  %v1406_v63 = vld [vmem:[%s3407_s8 + $0x3a8] sm:$0xff] }
 0x8d3   : > { %v1194_v9 = vpop.permute.xlu1 %1193  ;;  %1218 = vmatprep.subr.mxu0 %v1204_v2  ;;  %v2387_v1 = vcombine.high %v1402_v62, %v1406_v63  ;;  %v2388_v0 = vcombine.low %v1402_v62, %v1406_v63  ;;  %v1409_v2 = vld [vmem:[%s3407_s8 + $0x3c0] sm:$0xff] }
 0x8d4   : > { %v1203_v6 = vsel %vm412_vm2, %v1194_v9, %v1196_v61  ;;  %v2386_v61 = vcombine.low %v1394_v57, %v1398_v58  ;;  %v2357_v9 = vcombine.high %v1409_v2, %v1413_v3  ;;  %v1331_v57 = vld [vmem:[%s3407_s8 + $0x150] sm:$0xff] }
 0x8d5   : > { %v1335_v58 = vld [vmem:[%s3407_s8 + $0x170] sm:$0xff] }
 0x8d6   : > { %1219 = vmatpush1.msra.mxu0 %v1203_v6  ;;  %v2358_v6 = vcombine.low %v1409_v2, %v1413_v3  ;;  %2132 = vmatprep.subr.bf16.mxu1 %v2357_v9  ;;  %v2401_v63 = vcombine.high %v1331_v57, %v1335_v58  ;;  %v1343_v2 = vld [vmem:[%s3407_s8 + $0x1b0] sm:$0xff]  ;;  %v1340_v3 = vld [vmem:[%s3407_s8 + $0x198] sm:$0xff]  ;;  %v2402_v9 = vcombine.low %v1331_v57, %v1335_v58 }
 0x8d7   : > { %2034 = vmatmul.mubr.msk.f32.vlgmr.msra.gmra.mrb[2].mxu0 %vm774_vm14, %v1171_v7  ;;  %2136 = vmatprep.subr.bf16.mxu0 %v2359_v5  ;;  %v1414_v5 = vld [vmem:[%s3407_s8 + $0x3e8] sm:$0xff]  ;;  %v1395_v58 = vld [vmem:[%s3407_s8 + $0x350] sm:$0xff] }
 0x8d8   : > { %2138 = vmatpush1.bf16.msra.mxu0 %v2360_v8  ;;  %v2389_v7 = vcombine.high %v1410_v4, %v1414_v5  ;;  %v2390_v8 = vcombine.low %v1410_v4, %v1414_v5  ;;  %2134 = vmatpush1.bf16.msra.mxu1 %v2358_v6  ;;  %v1344_v4 = vld [vmem:[%s3407_s8 + $0x1b8] sm:$0xff] }
 0x8d9   : > { %2140 = vmatprep.subr.bf16.mxu0 %v2361_v12  ;;  %v1291_v12 = vld [vmem:[%s3407_s8 + $0x10] sm:$0xff] }
 0x8da   : > { %v2392_v17 = vcombine.low %v1291_v12, %v1295_v13 }
 0x8dc   : > { %2142 = vmatpush1.bf16.msra.mxu0 %v2362_v15  ;;  %v2391_v15 = vcombine.high %v1291_v12, %v1295_v13  ;;  %v1351_v12 = vld [vmem:[%s3407_s8 + $0x1f0] sm:$0xff]  ;;  %v1348_v13 = vld [vmem:[%s3407_s8 + $0x1d8] sm:$0xff] }
 0x8dd   : > { %2144 = vmatprep.subr.bf16.mxu0 %v2363_v16  ;;  %v1296_v16 = vld [vmem:[%s3407_s8 + $0x38] sm:$0xff] }
 0x8de   : > { %v2423_v18 = vcombine.high %v1292_v14, %v1296_v16  ;;  %2200 = vmatprep.subr.bf16.mxu1 %v2391_v15 }
 0x8e0   : > { %2146 = vmatpush1.bf16.msra.mxu0 %v2364_v20  ;;  %v2424_v20 = vcombine.low %v1292_v14, %v1296_v16  ;;  %v1352_v14 = vld [vmem:[%s3407_s8 + $0x1f8] sm:$0xff]  ;;  %v2436_v16 = vcombine.low %v1340_v3, %v1344_v4 }
 0x8e1   : > { %2148 = vmatprep.subr.bf16.mxu0 %v2365_v23  ;;  %v1176_v23 = vpop.permute.xlu0 %1175 }
 0x8e4   : > { %2150 = vmatpush1.bf16.msra.mxu0 %v2366_v26 }
 0x8e5   : > { %2152 = vmatprep.subr.bf16.mxu0 %v2367_v28 }
 0x8e8   : > { %2154 = vmatpush1.bf16.msra.mxu0 %v2368_v31  ;;  %v1299_v31 = vld [vmem:[%s3407_s8 + $0x50] sm:$0xff] }
 0x8e9   : > { %2156 = vmatprep.subr.bf16.mxu0 %v2369_v34  ;;  %v1303_v34 = vld [vmem:[%s3407_s8 + $0x70] sm:$0xff] }
 0x8ea   : > { %v2394_v22 = vcombine.low %v1299_v31, %v1303_v34 }
 0x8ec   : > { %2158 = vmatpush1.bf16.msra.mxu0 %v2370_v37 }
 0x8ed   : > { %2160 = vmatprep.subr.bf16.mxu0 %v2371_v38  ;;  %v2393_v38 = vcombine.high %v1299_v31, %v1303_v34  ;;  %v1363_v31 = vld [vmem:[%s3407_s8 + $0x250] sm:$0xff] }
 0x8ee   : > { %v1367_v34 = vld [vmem:[%s3407_s8 + $0x270] sm:$0xff] }
 0x8f0   : > { %2162 = vmatpush1.bf16.msra.mxu0 %v2372_v41  ;;  %v1308_v41 = vld [vmem:[%s3407_s8 + $0x98] sm:$0xff] }
 0x8f1   : > { %2164 = vmatprep.subr.bf16.mxu0 %v2373_v42  ;;  %v1312_v42 = vld [vmem:[%s3407_s8 + $0xb8] sm:$0xff] }
 0x8f2   : > { %v2428_v33 = vcombine.low %v1308_v41, %v1312_v42 }
 0x8f4   : > { %2166 = vmatpush1.bf16.msra.mxu0 %v2374_v21 }
 0x8f5   : > { %2168 = vmatprep.subr.bf16.mxu0 %v2375_v32  ;;  %v2427_v32 = vcombine.high %v1308_v41, %v1312_v42  ;;  %v1375_v41 = vld [vmem:[%s3407_s8 + $0x2b0] sm:$0xff]  ;;  %v1372_v42 = vld [vmem:[%s3407_s8 + $0x298] sm:$0xff] }
 0x8f8   : > { %2170 = vmatpush1.bf16.msra.mxu0 %v2376_v46  ;;  %v1316_v46 = vld [vmem:[%s3407_s8 + $0xd8] sm:$0xff] }
 0x8f9   : > { %2172 = vmatprep.subr.bf16.mxu0 %v2377_v27  ;;  %v1320_v27 = vld [vmem:[%s3407_s8 + $0xf8] sm:$0xff] }
 0x8fa   : > { %v2430_v54 = vcombine.low %v1316_v46, %v1320_v27 }
 0x8fc   : > { %2174 = vmatpush1.bf16.msra.mxu0 %v2378_v48  ;;  %v2397_v48 = vcombine.high %v1315_v44, %v1319_v45  ;;  %v1379_v45 = vld [vmem:[%s3407_s8 + $0x2d0] sm:$0xff] }
 0x8fd   : > { %2176 = vmatprep.subr.bf16.mxu0 %v2379_v19  ;;  %v2429_v19 = vcombine.high %v1316_v46, %v1320_v27  ;;  %v1383_v46 = vld [vmem:[%s3407_s8 + $0x2f0] sm:$0xff]  ;;  %v1380_v27 = vld [vmem:[%s3407_s8 + $0x2d8] sm:$0xff] }
 0x900   : > { %2178 = vmatpush1.bf16.msra.mxu0 %v2380_v51  ;;  %v1324_v51 = vld [vmem:[%s3407_s8 + $0x118] sm:$0xff] }
 0x901   : > { %2180 = vmatprep.subr.bf16.mxu0 %v2381_v52  ;;  %v1328_v52 = vld [vmem:[%s3407_s8 + $0x138] sm:$0xff] }
 0x902   : > { %v2432_v62 = vcombine.low %v1324_v51, %v1328_v52 }
 0x904   : > { %2182 = vmatpush1.bf16.msra.mxu0 %v2382_v55  ;;  %v2399_v55 = vcombine.high %v1323_v49, %v1327_v50 }
 0x905   : > { %2184 = vmatprep.subr.bf16.mxu0 %v2383_v56  ;;  %v2431_v56 = vcombine.high %v1324_v51, %v1328_v52  ;;  %v1391_v51 = vld [vmem:[%s3407_s8 + $0x330] sm:$0xff]  ;;  %v1388_v52 = vld [vmem:[%s3407_s8 + $0x318] sm:$0xff] }
 0x908   : > { %2186 = vmatpush1.bf16.msra.mxu0 %v2384_v59  ;;  %v1332_v59 = vld [vmem:[%s3407_s8 + $0x158] sm:$0xff] }
 0x909   : > { %2188 = vmatprep.subr.bf16.mxu0 %v2385_v60  ;;  %v1336_v60 = vld [vmem:[%s3407_s8 + $0x178] sm:$0xff] }
 0x90a   : > { %v2434_v5 = vcombine.low %v1332_v59, %v1336_v60 }
 0x90c   : > { %2190 = vmatpush1.bf16.msra.mxu0 %v2386_v61  ;;  %v2400_v61 = vcombine.low %v1323_v49, %v1327_v50  ;;  %v1387_v50 = vld [vmem:[%s3407_s8 + $0x310] sm:$0xff] }
 0x90d   : > { %2192 = vmatprep.subr.bf16.mxu0 %v2387_v1  ;;  %v2433_v1 = vcombine.high %v1332_v59, %v1336_v60  ;;  %v1399_v59 = vld [vmem:[%s3407_s8 + $0x370] sm:$0xff]  ;;  %v1396_v60 = vld [vmem:[%s3407_s8 + $0x358] sm:$0xff] }
 0x910   : > { %2194 = vmatpush1.bf16.msra.mxu0 %v2388_v0  ;;  %v1339_v0 = vld [vmem:[%s3407_s8 + $0x190] sm:$0xff] }
 0x911   : > { %2196 = vmatprep.subr.bf16.mxu0 %v2389_v7  ;;  %v2403_v6 = vcombine.high %v1339_v0, %v1343_v2  ;;  %v2435_v7 = vcombine.high %v1340_v3, %v1344_v4  ;;  %v2404_v15 = vcombine.low %v1339_v0, %v1343_v2  ;;  %v1403_v2 = vld [vmem:[%s3407_s8 + $0x390] sm:$0xff]  ;;  %v1404_v4 = vld [vmem:[%s3407_s8 + $0x398] sm:$0xff] }
 0x912   : > { %v1407_v3 = vld [vmem:[%s3407_s8 + $0x3b0] sm:$0xff] }
 0x914   : > { %2198 = vmatpush1.bf16.msra.mxu0 %v2390_v8  ;;  %v1347_v8 = vld [vmem:[%s3407_s8 + $0x1d0] sm:$0xff] }
 0x915   : > { %2264 = vmatprep.subr.bf16.mxu0 %v2423_v18  ;;  %v2437_v18 = vcombine.high %v1348_v13, %v1352_v14 }
 0x9aa   : > { %v1280_v24 = vpop.f32.mrb[2].mxu0 }
 0x9ab   : > { %v1281_v25 = vadd.f32 %v1280_v24, %v1176_v23  ;;  %v1282_v26 = vpop.f32.mrb[3].mxu0  ;;  %v1356_v24 = vld [vmem:[%s3407_s8 + $0x218] sm:$0xff] }
 0x9ac   : > { %v1283_v28 = vadd.f32 %v1282_v26, %v1176_v23  ;;  %v1359_v23 = vld [vmem:[%s3407_s8 + $0x230] sm:$0xff]  ;;  %v2406_v26 = vcombine.low %v1347_v8, %v1351_v12 }
 0x9ad   : > { %v1285_v29 = vadd.f32 %v1281_v25, %v2878_v10  ;;  %v1360_v25 = vld [vmem:[%s3407_s8 + $0x238] sm:$0xff] }
 0x9ae   : > { %v1286_v30 = vadd.f32 %v1283_v28, %v2880_v11  ;;  %v1307_v11 = vld [vmem:[%s3407_s8 + $0x90] sm:$0xff]  ;;  %v2438_v28 = vcombine.low %v1348_v13, %v1352_v14  ;;  %v1412_v14 = vld [vmem:[%s3407_s8 + $0x3d8] sm:$0xff] }
 0x9af   : > { %v3218_v10 = vmax.f32 %v1285_v29, 0.0  ;;  %v2395_v21 = vcombine.high %v1307_v11, %v1311_v40  ;;  %v2396_v47 = vcombine.low %v1307_v11, %v1311_v40  ;;  %v2440_v11 = vcombine.low %v1356_v24, %v1360_v25  ;;  %v1371_v40 = vld [vmem:[%s3407_s8 + $0x290] sm:$0xff] }
 0x9b0   : > { %v1288_v37 = vmax.f32 %v1286_v30, 0.0  ;;  %v2439_v30 = vcombine.high %v1356_v24, %v1360_v25  ;;  %v1415_v13 = vld [vmem:[%s3407_s8 + $0x3f0] sm:$0xff] }
 0x9b2   : > { %1737 = vmatprep.mubr.f32.mxu1 %v1288_v37  ;;  %1808 = vmatprep.mubr.f32.mxu0 %v1288_v37 }
 0x9b3   : > { %1738 = vmatmul.mubr.f32.vlgmr.msra.gmra.mrb[6].mxu1 %v3218_v10  ;;  %1809 = vmatmul.mubr.f32.vlgmr.msra.gmra.mrb[4].mxu0 %v3218_v10 }
 0x9b4   : > { %2202 = vmatpush1.bf16.msra.mxu1 %v2392_v17  ;;  %2266 = vmatpush1.bf16.msra.mxu0 %v2424_v20  ;;  %v2405_v17 = vcombine.high %v1347_v8, %v1351_v12  ;;  %v1355_v20 = vld [vmem:[%s3407_s8 + $0x210] sm:$0xff] }
 0x9b5   : > { %1879 = vmatprep.mubr.f32.mxu1 %v1288_v37  ;;  %1950 = vmatprep.mubr.f32.mxu0 %v1288_v37  ;;  %v2407_v29 = vcombine.high %v1355_v20, %v1359_v23  ;;  %v2408_v37 = vcombine.low %v1355_v20, %v1359_v23  ;;  %v1411_v12 = vld [vmem:[%s3407_s8 + $0x3d0] sm:$0xff] }
 0x9b6   : > { %2204 = vmatprep.subr.bf16.mxu1 %v2393_v38  ;;  %2268 = vmatprep.subr.bf16.mxu0 %v2425_v39  ;;  %v2409_v38 = vcombine.high %v1363_v31, %v1367_v34  ;;  %v2441_v39 = vcombine.high %v1364_v35, %v1368_v36  ;;  %v2422_v23 = vcombine.low %v1411_v12, %v1415_v13 }
 0x9b8   : > { %2206 = vmatpush1.bf16.msra.mxu1 %v2394_v22  ;;  %2270 = vmatpush1.bf16.msra.mxu0 %v2426_v43  ;;  %v1376_v22 = vld [vmem:[%s3407_s8 + $0x2b8] sm:$0xff]  ;;  %v2410_v43 = vcombine.low %v1363_v31, %v1367_v34 }
 0x9b9   : > { %2208 = vmatprep.subr.bf16.mxu1 %v2395_v21  ;;  %2272 = vmatprep.subr.bf16.mxu0 %v2427_v32  ;;  %v2442_v21 = vcombine.low %v1364_v35, %v1368_v36  ;;  %v2411_v32 = vcombine.high %v1371_v40, %v1375_v41  ;;  %v2443_v44 = vcombine.high %v1372_v42, %v1376_v22 }
 0x9bc   : > { %2210 = vmatpush1.bf16.msra.mxu1 %v2396_v47  ;;  %2274 = vmatpush1.bf16.msra.mxu0 %v2428_v33  ;;  %v1384_v47 = vld [vmem:[%s3407_s8 + $0x2f8] sm:$0xff]  ;;  %v2412_v33 = vcombine.low %v1371_v40, %v1375_v41 }
 0x9bd   : > { %2212 = vmatprep.subr.bf16.mxu1 %v2397_v48  ;;  %2276 = vmatprep.subr.bf16.mxu0 %v2429_v19  ;;  %v2444_v48 = vcombine.low %v1372_v42, %v1376_v22  ;;  %v2413_v19 = vcombine.high %v1379_v45, %v1383_v46  ;;  %v2445_v49 = vcombine.high %v1380_v27, %v1384_v47 }
 0x9c0   : > { %2214 = vmatpush1.bf16.msra.mxu1 %v2398_v53  ;;  %2278 = vmatpush1.bf16.msra.mxu0 %v2430_v54  ;;  %v1392_v53 = vld [vmem:[%s3407_s8 + $0x338] sm:$0xff]  ;;  %v2414_v54 = vcombine.low %v1379_v45, %v1383_v46 }
 0x9c1   : > { %2216 = vmatprep.subr.bf16.mxu1 %v2399_v55  ;;  %2280 = vmatprep.subr.bf16.mxu0 %v2431_v56  ;;  %v2446_v55 = vcombine.low %v1380_v27, %v1384_v47  ;;  %v2415_v56 = vcombine.high %v1387_v50, %v1391_v51  ;;  %v2447_v57 = vcombine.high %v1388_v52, %v1392_v53 }
 0x9c4   : > { %2218 = vmatpush1.bf16.msra.mxu1 %v2400_v61  ;;  %2282 = vmatpush1.bf16.msra.mxu0 %v2432_v62  ;;  %v1400_v61 = vld [vmem:[%s3407_s8 + $0x378] sm:$0xff]  ;;  %v2416_v62 = vcombine.low %v1387_v50, %v1391_v51 }
 0x9c5   : > { %2220 = vmatprep.subr.bf16.mxu1 %v2401_v63  ;;  %2284 = vmatprep.subr.bf16.mxu0 %v2433_v1  ;;  %v2448_v63 = vcombine.low %v1388_v52, %v1392_v53  ;;  %v2417_v1 = vcombine.high %v1395_v58, %v1399_v59  ;;  %v2449_v0 = vcombine.high %v1396_v60, %v1400_v61 }
 0x9c8   : > { %2222 = vmatpush1.bf16.msra.mxu1 %v2402_v9  ;;  %2286 = vmatpush1.bf16.msra.mxu0 %v2434_v5  ;;  %v1408_v9 = vld [vmem:[%s3407_s8 + $0x3b8] sm:$0xff]  ;;  %v2418_v5 = vcombine.low %v1395_v58, %v1399_v59 }
 0x9c9   : > { %2224 = vmatprep.subr.bf16.mxu1 %v2403_v6  ;;  %2288 = vmatprep.subr.bf16.mxu0 %v2435_v7  ;;  %v2450_v6 = vcombine.low %v1396_v60, %v1400_v61  ;;  %v2419_v7 = vcombine.high %v1403_v2, %v1407_v3  ;;  %v2451_v8 = vcombine.high %v1404_v4, %v1408_v9 }
 0x9cc   : > { %2226 = vmatpush1.bf16.msra.mxu1 %v2404_v15  ;;  %2290 = vmatpush1.bf16.msra.mxu0 %v2436_v16  ;;  %v1416_v15 = vld [vmem:[%s3407_s8 + $0x3f8] sm:$0xff]  ;;  %v2420_v16 = vcombine.low %v1403_v2, %v1407_v3 }
 0x9cd   : > { %2228 = vmatprep.subr.bf16.mxu1 %v2405_v17  ;;  %2292 = vmatprep.subr.bf16.mxu0 %v2437_v18  ;;  %v2452_v17 = vcombine.low %v1404_v4, %v1408_v9  ;;  %v2421_v18 = vcombine.high %v1411_v12, %v1415_v13  ;;  %v2453_v20 = vcombine.high %v1412_v14, %v1416_v15 }
 0x9ce   : > { %v2454_v24 = vcombine.low %v1412_v14, %v1416_v15 }
 0x9d0   : > { %2230 = vmatpush1.bf16.msra.mxu1 %v2406_v26  ;;  %2294 = vmatpush1.bf16.msra.mxu0 %v2438_v28 }
 0x9d1   : > { %2232 = vmatprep.subr.bf16.mxu1 %v2407_v29  ;;  %2296 = vmatprep.subr.bf16.mxu0 %v2439_v30 }
 0x9d4   : > { %2234 = vmatpush1.bf16.msra.mxu1 %v2408_v37  ;;  %2298 = vmatpush1.bf16.msra.mxu0 %v2440_v11 }
 0x9d5   : > { %2236 = vmatprep.subr.bf16.mxu1 %v2409_v38  ;;  %2300 = vmatprep.subr.bf16.mxu0 %v2441_v39 }
 0x9d8   : > { %2238 = vmatpush1.bf16.msra.mxu1 %v2410_v43  ;;  %2302 = vmatpush1.bf16.msra.mxu0 %v2442_v21 }
 0x9d9   : > { %2240 = vmatprep.subr.bf16.mxu1 %v2411_v32  ;;  %2304 = vmatprep.subr.bf16.mxu0 %v2443_v44 }
 0x9dc   : > { %2242 = vmatpush1.bf16.msra.mxu1 %v2412_v33  ;;  %2306 = vmatpush1.bf16.msra.mxu0 %v2444_v48 }
 0x9dd   : > { %2244 = vmatprep.subr.bf16.mxu1 %v2413_v19  ;;  %2308 = vmatprep.subr.bf16.mxu0 %v2445_v49 }
 0x9e0   : > { %2246 = vmatpush1.bf16.msra.mxu1 %v2414_v54  ;;  %2310 = vmatpush1.bf16.msra.mxu0 %v2446_v55 }
 0x9e1   : > { %2248 = vmatprep.subr.bf16.mxu1 %v2415_v56  ;;  %2312 = vmatprep.subr.bf16.mxu0 %v2447_v57 }
 0x9e4   : > { %2250 = vmatpush1.bf16.msra.mxu1 %v2416_v62  ;;  %2314 = vmatpush1.bf16.msra.mxu0 %v2448_v63 }
 0x9e5   : > { %2252 = vmatprep.subr.bf16.mxu1 %v2417_v1  ;;  %2316 = vmatprep.subr.bf16.mxu0 %v2449_v0 }
 0x9e8   : > { %2254 = vmatpush1.bf16.msra.mxu1 %v2418_v5  ;;  %2318 = vmatpush1.bf16.msra.mxu0 %v2450_v6 }
 0x9e9   : > { %2256 = vmatprep.subr.bf16.mxu1 %v2419_v7  ;;  %2320 = vmatprep.subr.bf16.mxu0 %v2451_v8 }
 0x9ec   : > { %2258 = vmatpush1.bf16.msra.mxu1 %v2420_v16  ;;  %2322 = vmatpush1.bf16.msra.mxu0 %v2452_v17 }
 0x9ed   : > { %2260 = vmatprep.subr.bf16.mxu1 %v2421_v18  ;;  %2324 = vmatprep.subr.bf16.mxu0 %v2453_v20 }
 0x9f0   : > { %2262 = vmatpush1.bf16.msra.mxu1 %v2422_v23  ;;  %2326 = vmatpush1.bf16.msra.mxu0 %v2454_v24 }
 0x9f3   : > { %1880 = vmatmul.mubr.f32.vlgmr.msra.gmra.mrb[8].mxu1 %v3218_v10  ;;  %1951 = vmatmul.mubr.f32.vlgmr.msra.gmra.mrb[6].mxu0 %v3218_v10 }
 0xa86   : > { %v1739_v25 = vpop.f32.mrb[6].mxu1  ;;  %v1810_v26 = vpop.f32.mrb[4].mxu0 }
 0xa87   : > { %1957 = vst [vmem:[%s332_s20] sm:$0xff] %v1739_v25  ;;  %1959 = vst [vmem:[%s332_s20 + $0x10] sm:$0xff] %v1810_v26  ;;  %v1741_v28 = vpop.f32.mrb[7].mxu1  ;;  %v1812_v29 = vpop.f32.mrb[5].mxu0 }
 0xa88   : > { %1958 = vst [vmem:[%s332_s20 + $0x8] sm:$0xff] %v1741_v28  ;;  %1960 = vst [vmem:[%s332_s20 + $0x18] sm:$0xff] %v1812_v29 }
 0xac6   : > { %v1881_v30 = vpop.f32.mrb[8].mxu1  ;;  %v1952_v31 = vpop.f32.mrb[6].mxu0 }
 0xac7   : > { %1961 = vst [vmem:[%s332_s20 + $0x20] sm:$0xff] %v1881_v30  ;;  %1963 = vst [vmem:[%s332_s20 + $0x30] sm:$0xff] %v1952_v31  ;;  %v1883_v34 = vpop.f32.mrb[9].mxu1  ;;  %v1954_v35 = vpop.f32.mrb[7].mxu0 }
 0xac8   : > { %1962 = vst [vmem:[%s332_s20 + $0x28] sm:$0xff] %v1883_v34  ;;  %1964 = vst [vmem:[%s332_s20 + $0x38] sm:$0xff] %v1954_v35 }
 0xac9 PF: > { %s19_s30 = sadd.s32 1, %s2669_s30  }
 0xaca   : > { %p16_p4 = scmp.ge.s32.totalorder %s19_s30, 4  }
 0xacc   :  { %18 = sbr.rel (!%p16_p4) target bundleno = 1 (0x1), region = 87 }

</bundles_post_ra>
